<compile_context>
chip_gen: v6e
topology: v6e:2x2x1
jax: 0.10.0
libtpu: 0.0.40
codegen_flags: <defaults>
</compile_context>

<pallas_src>
import functools

import jax
import jax.numpy as jnp
from jax.experimental import pallas as pl
from jax.experimental.pallas import tpu as pltpu


def attend_kernel(a_ref, b_ref, w_ref, bias_ref, beta_ref, alpha_ref, *,
                  compute_dtype):
    nb, la, d = a_ref.shape          # batch block, premise len, feature dim
    _, lb, _ = b_ref.shape           # hypothesis len
    h = w_ref.shape[1]

    a = a_ref[...]                               # (nb, la, d) f32
    b = b_ref[...]                               # (nb, lb, d) f32
    w = w_ref[...].astype(compute_dtype)         # (d, h)
    bias = bias_ref[...].astype(jnp.float32)     # (1, h)

    a_cd = a.astype(compute_dtype)
    b_cd = b.astype(compute_dtype)

    # ---- shared MLP f(x) = ReLU(x @ W + bias), fused over the whole block ----
    f_a = jnp.dot(a_cd.reshape(nb * la, d), w, preferred_element_type=jnp.float32)
    f_b = jnp.dot(b_cd.reshape(nb * lb, d), w, preferred_element_type=jnp.float32)
    f_a = jnp.maximum(f_a + bias, 0.0).reshape(nb, la, h).astype(compute_dtype)
    f_b = jnp.maximum(f_b + bias, 0.0).reshape(nb, lb, h).astype(compute_dtype)

    # ---- attention scores in both orientations (f32 accumulation) ----
    # Computing e^T as its own tiny MXU matmul (instead of transposing e or
    # looping over items) keeps both softmaxes as lane-axis reductions and
    # keeps every contraction in the canonical batched-matmul form.
    e = jnp.einsum("bih,bjh->bij", f_a, f_b,
                   preferred_element_type=jnp.float32)           # (nb, la, lb)
    et = jnp.einsum("bjh,bih->bji", f_b, f_a,
                    preferred_element_type=jnp.float32)          # (nb, lb, la)

    # ---- beta = softmax(e, axis=-1) @ B ----
    p = jnp.exp(e - jnp.max(e, axis=-1, keepdims=True))
    p = p * pl.reciprocal(jnp.sum(p, axis=-1, keepdims=True), approx=True)
    beta = jnp.einsum("bij,bjd->bid", p.astype(compute_dtype), b_cd,
                      preferred_element_type=jnp.float32)        # (nb, la, d)

    # ---- alpha = softmax(e^T, axis=-1) @ A ----
    q = jnp.exp(et - jnp.max(et, axis=-1, keepdims=True))
    q = q * pl.reciprocal(jnp.sum(q, axis=-1, keepdims=True), approx=True)
    alpha = jnp.einsum("bji,bid->bjd", q.astype(compute_dtype), a_cd,
                       preferred_element_type=jnp.float32)       # (nb, lb, d)

    # ---- lane-dense stores: flatten (L, D) -> L*D (multiple of 128 lanes) ----
    beta_ref[...] = beta.reshape(nb, la * d).astype(beta_ref.dtype)
    alpha_ref[...] = alpha.reshape(nb, lb * d).astype(alpha_ref.dtype)


def _pick_block_n(n, max_block=8):
    """Batch items per grid step.

    Prefer a sublane-aligned (multiple-of-8) divisor of `n` that leaves at
    least 2 grid steps (keeps both v7x TensorCores busy); otherwise fall back
    to an aligned divisor or the whole (small) batch, else 1 item per step.
    """
    for cand in range(min(max_block, n), 0, -1):
        if n % cand == 0 and cand % 8 == 0 and n // cand >= 2:
            return cand
    for cand in range(min(max_block, n), 0, -1):
        if n % cand == 0 and (cand % 8 == 0 or cand == n):
            return cand
    return 1


def attend(A, B, W, bias, *, block_n=None, compute_dtype=jnp.bfloat16):
    """A: (N, La, D), B: (N, Lb, D), W: (D, H), bias: (H,) -> (beta, alpha)."""
    N, La, D = A.shape
    Nb_, Lb, Db_ = B.shape
    assert Nb_ == N and Db_ == D
    H = W.shape[1]
    bias2d = bias.reshape(1, H)

    if block_n is None:
        block_n = _pick_block_n(N)
    assert N % block_n == 0, (N, block_n)
    grid = (N // block_n,)

    # NOTE: per-step VMEM footprint = block_n*(La+Lb)*D inputs + 2*block_n*La*Lb
    # f32 scores + lane-dense outputs (double-buffered) -- tiny here.  For long
    # sequences, tile Lb with online-softmax accumulation and budget against
    # v7x's 64 MiB VMEM.
    grid_spec = pltpu.PrefetchScalarGridSpec(
        num_scalar_prefetch=0,
        grid=grid,
        in_specs=[
            pl.BlockSpec((block_n, La, D), lambda n: (n, 0, 0)),   # A block
            pl.BlockSpec((block_n, Lb, D), lambda n: (n, 0, 0)),   # B block
            pl.BlockSpec((D, H), lambda n: (0, 0)),                # W (shared)
            pl.BlockSpec((1, H), lambda n: (0, 0)),                # bias (shared)
        ],
        out_specs=[
            pl.BlockSpec((block_n, La * D), lambda n: (n, 0)),     # beta (lane-dense)
            pl.BlockSpec((block_n, Lb * D), lambda n: (n, 0)),     # alpha (lane-dense)
        ],
    )

    beta_flat, alpha_flat = pl.pallas_call(
        functools.partial(attend_kernel, compute_dtype=compute_dtype),
        out_shape=(
            jax.ShapeDtypeStruct((N, La * D), A.dtype),
            jax.ShapeDtypeStruct((N, Lb * D), A.dtype),
        ),
        grid_spec=grid_spec,
        compiler_params=pltpu.CompilerParams(
            dimension_semantics=("parallel",)),
    )(A, B, W, bias2d)

    return beta_flat.reshape(N, La, D), alpha_flat.reshape(N, Lb, D)


def attend_reference(A, B, W, bias, compute_dtype=jnp.bfloat16):
    """Pure-JAX reference mirroring the kernel's mixed precision (bf16 MXU
    operands, f32 accumulation).  Correct for La != Lb."""
    cd = compute_dtype

    def f(x):
        y = jnp.einsum("nld,dh->nlh", x.astype(cd), W.astype(cd),
                       preferred_element_type=jnp.float32)
        return jnp.maximum(y + bias.astype(jnp.float32), 0.0).astype(cd)

    f_A, f_B = f(A), f(B)
    e = jnp.einsum("nih,njh->nij", f_A, f_B, preferred_element_type=jnp.float32)
    p = jax.nn.softmax(e, axis=-1)      # row softmax -> beta weights
    q = jax.nn.softmax(e, axis=1)       # col softmax == softmax(e^T, -1).T
    beta = jnp.einsum("nij,njd->nid", p.astype(cd), B.astype(cd),
                      preferred_element_type=jnp.float32)
    alpha = jnp.einsum("nij,nid->njd", q.astype(cd), A.astype(cd),
                       preferred_element_type=jnp.float32)
    return beta.astype(A.dtype), alpha.astype(A.dtype)


if __name__ == "__main__":
    key = jax.random.PRNGKey(0)
    k_a, k_b, k_w, k_bias = jax.random.split(key, 4)

    # Small shapes consistent with the module (num_inputs_attend == embed_size).
    batch = 16                 # blocked 8 per grid step -> 2 parallel grid steps
    seq_a, seq_b = 8, 16       # premise / hypothesis lengths (La != Lb exercised)
    embed_size = 32            # num_inputs_attend
    num_hiddens = 32

    A = jax.random.normal(k_a, (batch, seq_a, embed_size), dtype=jnp.float32)
    B = jax.random.normal(k_b, (batch, seq_b, embed_size), dtype=jnp.float32)
    W = jax.random.normal(k_w, (embed_size, num_hiddens), dtype=jnp.float32) \
        * (1.0 / embed_size ** 0.5)
    bias = jax.random.normal(k_bias, (num_hiddens,), dtype=jnp.float32) * 0.01

    beta, alpha = attend(A, B, W, bias)
    jax.block_until_ready((beta, alpha))

    beta_ref, alpha_ref = attend_reference(A, B, W, bias)
    assert beta.shape == (batch, seq_a, embed_size)
    assert alpha.shape == (batch, seq_b, embed_size)
    assert jnp.allclose(beta, beta_ref, atol=1e-2, rtol=1e-2), \
        float(jnp.max(jnp.abs(beta - beta_ref)))
    assert jnp.allclose(alpha, alpha_ref, atol=1e-2, rtol=1e-2), \
        float(jnp.max(jnp.abs(alpha - alpha_ref)))

    print("KERNEL_OK")
</pallas_src>

<mosaic_0001>
module attributes {stable_mosaic.version = 11 : i64} {
  func.func @attend_kernel(%arg0: i32, %arg1: memref<8x8x32xf32, #tpu.memory_space<vmem>>, %arg2: memref<8x16x32xf32, #tpu.memory_space<vmem>>, %arg3: memref<32x32xf32, #tpu.memory_space<vmem>>, %arg4: memref<1x32xf32, #tpu.memory_space<vmem>>, %arg5: memref<8x256xf32, #tpu.memory_space<vmem>>, %arg6: memref<8x512xf32, #tpu.memory_space<vmem>>) attributes {dimension_semantics = [#tpu.dimension_semantics<parallel>], iteration_bounds = array<i64: 2>, scalar_prefetch = 0 : i64, scratch_operands = 0 : i64, tpu.core_type = #tpu.core_type<tc>, window_params = [{transform_indices = @transform_0, window_bounds = array<i64: 8, 8, 32>}, {transform_indices = @transform_1, window_bounds = array<i64: 8, 16, 32>}, {pipeline_mode = #tpu.pipeline_mode<synchronous>, transform_indices = @transform_2, window_bounds = array<i64: 32, 32>}, {pipeline_mode = #tpu.pipeline_mode<synchronous>, transform_indices = @transform_3, window_bounds = array<i64: 1, 32>}, {transform_indices = @transform_4, window_bounds = array<i64: 8, 256>}, {transform_indices = @transform_5, window_bounds = array<i64: 8, 512>}]} {
    %c0 = arith.constant 0 : index
    %c0_0 = arith.constant 0 : index
    %c0_1 = arith.constant 0 : index
    %0 = vector.load %arg1[%c0, %c0_0, %c0_1] : memref<8x8x32xf32, #tpu.memory_space<vmem>>, vector<8x8x32xf32>
    %c0_2 = arith.constant 0 : index
    %c0_3 = arith.constant 0 : index
    %c0_4 = arith.constant 0 : index
    %1 = vector.load %arg2[%c0_2, %c0_3, %c0_4] : memref<8x16x32xf32, #tpu.memory_space<vmem>>, vector<8x16x32xf32>
    %c0_5 = arith.constant 0 : index
    %c0_6 = arith.constant 0 : index
    %2 = vector.load %arg3[%c0_5, %c0_6] : memref<32x32xf32, #tpu.memory_space<vmem>>, vector<32x32xf32>
    %3 = arith.truncf %2 : vector<32x32xf32> to vector<32x32xbf16>
    %c0_7 = arith.constant 0 : index
    %c0_8 = arith.constant 0 : index
    %4 = vector.load %arg4[%c0_7, %c0_8] : memref<1x32xf32, #tpu.memory_space<vmem>>, vector<1x32xf32>
    %5 = arith.truncf %0 : vector<8x8x32xf32> to vector<8x8x32xbf16>
    %6 = arith.truncf %1 : vector<8x16x32xf32> to vector<8x16x32xbf16>
    %7 = vector.shape_cast %5 : vector<8x8x32xbf16> to vector<64x32xbf16>
    %cst = arith.constant dense<0.000000e+00> : vector<64x32xf32>
    %8 = tpu.matmul %7, %3, %cst {dimension_numbers = #tpu.dot_dimension_numbers<[1], [0], [0], [1], [0, 0, 1, 1], [], []>} : vector<64x32xbf16>, vector<32x32xbf16>, vector<64x32xf32> -> vector<64x32xf32>
    %9 = vector.shape_cast %6 : vector<8x16x32xbf16> to vector<128x32xbf16>
    %cst_9 = arith.constant dense<0.000000e+00> : vector<128x32xf32>
    %10 = tpu.matmul %9, %3, %cst_9 {dimension_numbers = #tpu.dot_dimension_numbers<[1], [0], [0], [1], [0, 0, 1, 1], [], []>} : vector<128x32xbf16>, vector<32x32xbf16>, vector<128x32xf32> -> vector<128x32xf32>
    %11 = vector.broadcast %4 : vector<1x32xf32> to vector<64x32xf32>
    %12 = arith.addf %8, %11 : vector<64x32xf32>
    %cst_10 = arith.constant 0.000000e+00 : f32
    %13 = vector.broadcast %cst_10 : f32 to vector<64x32xf32>
    %14 = arith.maximumf %12, %13 : vector<64x32xf32>
    %15 = vector.shape_cast %14 : vector<64x32xf32> to vector<8x8x32xf32>
    %16 = arith.truncf %15 : vector<8x8x32xf32> to vector<8x8x32xbf16>
    %17 = vector.broadcast %4 : vector<1x32xf32> to vector<128x32xf32>
    %18 = arith.addf %10, %17 : vector<128x32xf32>
    %cst_11 = arith.constant 0.000000e+00 : f32
    %19 = vector.broadcast %cst_11 : f32 to vector<128x32xf32>
    %20 = arith.maximumf %18, %19 : vector<128x32xf32>
    %21 = vector.shape_cast %20 : vector<128x32xf32> to vector<8x16x32xf32>
    %22 = arith.truncf %21 : vector<8x16x32xf32> to vector<8x16x32xbf16>
    "tpu.trace_start"() <{level = 10 : i32, message = "bih,bjh->bij"}> : () -> ()
    %cst_12 = arith.constant dense<0.000000e+00> : vector<8x8x16xf32>
    %23 = tpu.matmul %16, %22, %cst_12 {dimension_numbers = #tpu.dot_dimension_numbers<[2], [2], [1], [1], [0, 0, 0, 1, 1, 1], [0], [0]>} : vector<8x8x32xbf16>, vector<8x16x32xbf16>, vector<8x8x16xf32> -> vector<8x8x16xf32>
    "tpu.trace_stop"() : () -> ()
    "tpu.trace_start"() <{level = 10 : i32, message = "bjh,bih->bji"}> : () -> ()
    %cst_13 = arith.constant dense<0.000000e+00> : vector<8x16x8xf32>
    %24 = tpu.matmul %22, %16, %cst_13 {dimension_numbers = #tpu.dot_dimension_numbers<[2], [2], [1], [1], [0, 0, 0, 1, 1, 1], [0], [0]>} : vector<8x16x32xbf16>, vector<8x8x32xbf16>, vector<8x16x8xf32> -> vector<8x16x8xf32>
    "tpu.trace_stop"() : () -> ()
    %cst_14 = arith.constant dense<0xFF800000> : vector<8x8xf32>
    %25 = vector.multi_reduction <maximumf>, %23, %cst_14 [2] : vector<8x8x16xf32> to vector<8x8xf32>
    %26 = vector.shape_cast %25 : vector<8x8xf32> to vector<8x8x1xf32>
    %27 = vector.broadcast %26 : vector<8x8x1xf32> to vector<8x8x16xf32>
    %28 = arith.subf %23, %27 : vector<8x8x16xf32>
    %29 = math.exp %28 : vector<8x8x16xf32>
    %cst_15 = arith.constant dense<0.000000e+00> : vector<8x8xf32>
    %30 = vector.multi_reduction <add>, %29, %cst_15 [2] : vector<8x8x16xf32> to vector<8x8xf32>
    %31 = vector.shape_cast %30 : vector<8x8xf32> to vector<8x8x1xf32>
    %32 = tpu.reciprocal %31 {approx = true} : vector<8x8x1xf32> -> vector<8x8x1xf32>
    %33 = vector.broadcast %32 : vector<8x8x1xf32> to vector<8x8x16xf32>
    %34 = arith.mulf %29, %33 : vector<8x8x16xf32>
    %35 = arith.truncf %34 : vector<8x8x16xf32> to vector<8x8x16xbf16>
    "tpu.trace_start"() <{level = 10 : i32, message = "bij,bjd->bid"}> : () -> ()
    %cst_16 = arith.constant dense<0.000000e+00> : vector<8x8x32xf32>
    %36 = tpu.matmul %35, %6, %cst_16 {dimension_numbers = #tpu.dot_dimension_numbers<[2], [1], [1], [2], [0, 0, 0, 1, 1, 2], [0], [0]>} : vector<8x8x16xbf16>, vector<8x16x32xbf16>, vector<8x8x32xf32> -> vector<8x8x32xf32>
    "tpu.trace_stop"() : () -> ()
    %cst_17 = arith.constant dense<0xFF800000> : vector<8x16xf32>
    %37 = vector.multi_reduction <maximumf>, %24, %cst_17 [2] : vector<8x16x8xf32> to vector<8x16xf32>
    %38 = vector.shape_cast %37 : vector<8x16xf32> to vector<8x16x1xf32>
    %39 = vector.broadcast %38 : vector<8x16x1xf32> to vector<8x16x8xf32>
    %40 = arith.subf %24, %39 : vector<8x16x8xf32>
    %41 = math.exp %40 : vector<8x16x8xf32>
    %cst_18 = arith.constant dense<0.000000e+00> : vector<8x16xf32>
    %42 = vector.multi_reduction <add>, %41, %cst_18 [2] : vector<8x16x8xf32> to vector<8x16xf32>
    %43 = vector.shape_cast %42 : vector<8x16xf32> to vector<8x16x1xf32>
    %44 = tpu.reciprocal %43 {approx = true} : vector<8x16x1xf32> -> vector<8x16x1xf32>
    %45 = vector.broadcast %44 : vector<8x16x1xf32> to vector<8x16x8xf32>
    %46 = arith.mulf %41, %45 : vector<8x16x8xf32>
    %47 = arith.truncf %46 : vector<8x16x8xf32> to vector<8x16x8xbf16>
    "tpu.trace_start"() <{level = 10 : i32, message = "bji,bid->bjd"}> : () -> ()
    %cst_19 = arith.constant dense<0.000000e+00> : vector<8x16x32xf32>
    %48 = tpu.matmul %47, %5, %cst_19 {dimension_numbers = #tpu.dot_dimension_numbers<[2], [1], [1], [2], [0, 0, 0, 1, 1, 2], [0], [0]>} : vector<8x16x8xbf16>, vector<8x8x32xbf16>, vector<8x16x32xf32> -> vector<8x16x32xf32>
    "tpu.trace_stop"() : () -> ()
    %49 = vector.shape_cast %36 : vector<8x8x32xf32> to vector<8x256xf32>
    %c0_20 = arith.constant 0 : index
    %c0_21 = arith.constant 0 : index
    %50 = vector.load %arg5[%c0_20, %c0_21] : memref<8x256xf32, #tpu.memory_space<vmem>>, vector<8x256xf32>
    tpu.vector_store %arg5[%c0_20, %c0_21], %49 {strides = array<i32>} : memref<8x256xf32, #tpu.memory_space<vmem>>, vector<8x256xf32>,
    %51 = vector.shape_cast %48 : vector<8x16x32xf32> to vector<8x512xf32>
    %c0_22 = arith.constant 0 : index
    %c0_23 = arith.constant 0 : index
    %52 = vector.load %arg6[%c0_22, %c0_23] : memref<8x512xf32, #tpu.memory_space<vmem>>, vector<8x512xf32>
    tpu.vector_store %arg6[%c0_22, %c0_23], %51 {strides = array<i32>} : memref<8x512xf32, #tpu.memory_space<vmem>>, vector<8x512xf32>,
    return
  }
  func.func @transform_0(%arg0: i32) -> (i32, i32, i32) {
    %c0_i32 = arith.constant 0 : i32
    %c0_i32_0 = arith.constant 0 : i32
    %c0_i32_1 = arith.constant 0 : i32
    return %arg0, %c0_i32, %c0_i32_0 : i32, i32, i32
  }
  func.func @transform_1(%arg0: i32) -> (i32, i32, i32) {
    %c0_i32 = arith.constant 0 : i32
    %c0_i32_0 = arith.constant 0 : i32
    %c0_i32_1 = arith.constant 0 : i32
    return %arg0, %c0_i32, %c0_i32_0 : i32, i32, i32
  }
  func.func @transform_2(%arg0: i32) -> (i32, i32) {
    %c0_i32 = arith.constant 0 : i32
    %c0_i32_0 = arith.constant 0 : i32
    %c0_i32_1 = arith.constant 0 : i32
    return %c0_i32, %c0_i32_0 : i32, i32
  }
  func.func @transform_3(%arg0: i32) -> (i32, i32) {
    %c0_i32 = arith.constant 0 : i32
    %c0_i32_0 = arith.constant 0 : i32
    %c0_i32_1 = arith.constant 0 : i32
    return %c0_i32, %c0_i32_0 : i32, i32
  }
  func.func @transform_4(%arg0: i32) -> (i32, i32) {
    %c0_i32 = arith.constant 0 : i32
    %c0_i32_0 = arith.constant 0 : i32
    return %arg0, %c0_i32 : i32, i32
  }
  func.func @transform_5(%arg0: i32) -> (i32, i32) {
    %c0_i32 = arith.constant 0 : i32
    %c0_i32_0 = arith.constant 0 : i32
    return %arg0, %c0_i32 : i32, i32
  }
}

</mosaic_0001>

<bundles_post_ra>
// kernel: tpu_custom_call.1
= control target key start
LH: loop header
LB: loop body
LE: loop exit
PB: predicated region body
PF: predicated region fallthrough
CT: control target
= control target key end

     0   :  { %s4772_s0 = inlined_call_operand.hbm [shape: f32[16,8,32], index: 0, kind: input, shape index: {}]   ;;  %s4773_s1 = inlined_call_operand.hbm [shape: f32[16,16,32], index: 1, kind: input, shape index: {}]   ;;  %s4774_s2 = inlined_call_operand.hbm [shape: f32[32,32], index: 2, kind: input, shape index: {}]   ;;  %s4775_s3 = inlined_call_operand.vmem [shape: f32[1,32], index: 3, kind: input, shape index: {}]   ;;  %s4776_s4 = inlined_call_operand.hbm [shape: f32[16,256], index: 4, kind: output, shape index: {0}]   ;;  %s4777_s5 = inlined_call_operand.hbm [shape: f32[16,512], index: 5, kind: output, shape index: {1}]  }
   0x1   :  { %4781 = sst [smem:[#allocation17_spill]] %s4772_s0 }
   0x2   :  { %4782 = sst [smem:[#allocation18_spill]] %s4774_s2 }
   0x3   :  { %11 = vsyncpa [#allocation3], 0 }
   0x4   :  { %13 = vsyncpa [#allocation3 + $0x1], 0 }
   0x5   :  { %14 = vsyncpa [#allocation6], 0 }
   0x6   :  { %16 = vsyncpa [#allocation6 + $0x1], 0 }
   0x7   :  { %17 = vsyncpa [#allocation4], 0 }
   0x8   :  { %19 = vsyncpa [#allocation4 + $0x1], 0 }
   0x9   :  { %20 = vsyncpa [#allocation10], 0 }
   0xa   :  { %22 = vsyncpa [#allocation10 + $0x1], 0  ;;  %s3794_s18 = smov 0   ;;  %s3796_s19 = smov 0  }
   0xb   :  { %s3798_s20 = smov 0   ;;  %s3800_s21 = smov 0  }
   0xc LB: > { %s3815_s22 = sadd.s32 4294967295, %s3748_s21   ;;  %s2997_s23 = sadd.s32 4294967294, %s3748_s21   ;;  %s3748_s21 = sphi %s3800_s21, %s4805_s21   ;;  %s3744_s20 = sphi %s3798_s20, %s4804_s20   ;;  %s3740_s19 = sphi %s3796_s19, %s4803_s19   ;;  %s3736_s18 = sphi %s3794_s18, %s4802_s18  }
   0xd   : > { %p48_p0 = scmp.ne.s32.totalorder %s3740_s19, %s3736_s18  ;;  %p4778_p1 = scmp.eq.s32.totalorder %s3815_s22, 0 }
   0xe   : > { %p146_p3 = scmp.eq.s32.totalorder %s2997_s23, 1  ;;  %p2998_p5 = scmp.ge.s32.totalorder %s3748_s21, 1 }
   0xf   : > { %p3824_p4 = por %p4778_p1, %p48_p0  ;;  %p179_p7 = scmp.lt.s32.totalorder %s3748_s21, 3 }
  0x10   : > { %p3829_p6 = por %p146_p3, %p48_p0  ;;  %s3750_s27 = smov [#allocation7]  }
  0x11   : > { %s4783_s24 = scalar_select %p3824_p4, 1, 0 }
  0x12   : > { %s4784_s25 = scalar_select %p3829_p6, 1, 0 }
  0x13   : > { %p3834_p8 = pnand %p2998_p5, %p179_p7  ;;  %s191_s28 = sshll.u32 %s3750_s27, 4  ;;  %s192_s28 = int_to_ptr.vmem [resolvable:$true] %s191_s28 }
  0x14   : > { %s3848_s30 = sadd.s32 1, %s3748_s21   ;;  %s35_s6 = sadd.s32 1, %s3744_s20 }
  0x15   : > { %p3396_p9 = pneg %p3834_p8  ;;  %s32_s7 = ssub.s32 %s3748_s21, %s3848_s30 }
  0x16   : > { %s3575_s8 = scalar_lea.vmem %s192_s28, 512  ;;  %p3583_p5 = scmp.lt.s32.totalorder %s192_s28, %s192_s28 }
  0x17   : > { %p3843_p11 = pnand %p3396_p9, %p4778_p1  ;;  %p3576_p13 = scmp.ne.s32.totalorder %s192_s28, %s3575_s8 }
  0x18   : > { %p3584_p7 = scmp.lt.s32.totalorder %s3575_s8, %s3575_s8 }
  0x19   : > { %p3566_p12 = pneg %p3843_p11 }
  0x1a   : > { %p3585_p10 = por %p3584_p7, %p3583_p5 }
  0x1b   : > { %p3578_p0 = pnand %p3576_p13, %p3566_p12 }
  0x1d   : > { %p3579_p3 = pneg %p3578_p0 }
  0x1f   : > { %p3586_p2 = pnand %p3585_p10, %p3579_p3 }
  0x21   : > { %3589 = shalt.err (!%p3586_p2)
}
  0x22   : > { %s3751_s9 = smov 128   ;;  %s3752_s10 = smov 8  }
  0x23   : > { %s4787_s2 = sld [smem:[#allocation18_spill]]  ;;  %p33_p2 = scmp.eq.s32.totalorder %s32_s7, 0 }
  0x24   : > { %p42_p9 = scmp.ne.s32.totalorder %s3744_s20, %s3740_s19  ;;  %p43_p10 = scmp.eq.s32.totalorder %s3748_s21, 0 }
  0x25   : > { %p3415_p12 = scmp.lt.s32.totalorder %s3748_s21, 2  ;;  %p4789_p0 = scmp.eq.s32.totalorder %s3815_s22, 1 }
  0x26   : > { %s3868_s13 = scalar_select %p33_p2, %s3744_s20, %s35_s6  }
  0x27   : > { %p44_p13 = por %p43_p10, %p42_p9  ;;  %p3872_p3 = por %p4789_p0, %p42_p9 }
  0x28   : > { %4788 = sst [smem:[#allocation16_spill]] %s3868_s13  ;;  %s3877_s15 = sand.u32 1, %s3744_s20  }
  0x29   : > { %3399 = dma.hbm_to_vmem [thread:$0]  (!%p3843_p11), %s4787_s2, 512, %s192_s28, [#allocation6], %s3751_s9, %s3751_s9, %s3752_s10  }
  0x2a   : > { %s4790_s14 = scalar_select %p3872_p3, 1, 0 }
  0x2b   : > { %s3071_s16 = sshll.u32 %s3748_s21, 10  ;;  %s3001_s17 = sshll.u32 %s3877_s15, 6 }
  0x2c   : > { %s4791_s0 = sld [smem:[#allocation17_spill]]  ;;  %s212_s29 = scalar_lea.vmem [#allocation2], %s3001_s17 }
  0x2d   : > { %s219_s6 = sshll.u32 %s212_s29, 4  ;;  %p3886_p11 = pnand %p3415_p12, %p44_p13  ;;  %s3890_s6 = int_to_ptr.vmem [resolvable:$true] %s219_s6 }
  0x2f   : > { %p3592_p7 = pneg %p3886_p11 }
  0x32   : > { %s3884_s28 = scalar_lea.hbm %s4791_s0, %s3071_s16  ;;  %s3595_s23 = scalar_lea.hbm %s4791_s0, 2048 }
  0x33   : > { %s3590_s12 = scalar_lea.hbm %s3884_s28, 1024  ;;  %p3596_p10 = scmp.lt.s32.totalorder %s3884_s28, %s4791_s0 }
  0x34   : > { %p3591_p5 = scmp.ne.s32.totalorder %s3884_s28, %s3590_s12  ;;  %p3597_p12 = scmp.lt.s32.totalorder %s3595_s23, %s3590_s12 }
  0x36   : > { %p3593_p2 = pnand %p3592_p7, %p3591_p5  ;;  %p3598_p13 = por %p3597_p12, %p3596_p10 }
  0x38   : > { %p3594_p9 = pneg %p3593_p2 }
  0x3a   : > { %p3599_p0 = pnand %p3598_p13, %p3594_p9 }
  0x3c   : > { %3602 = shalt.err (!%p3599_p0)
}
  0x3d   : > { %s3603_s8 = scalar_lea.vmem %s3890_s6, 1024  ;;  %s3753_s16 = smov [#allocation2]  }
  0x3e   : > { %p3604_p1 = scmp.ne.s32.totalorder %s3890_s6, %s3603_s8  ;;  %s3608_s17 = sshll.u32 %s3753_s16, 4  ;;  %s3609_s17 = int_to_ptr.vmem [resolvable:$false] %s3608_s17 }
  0x3f   : > { %s3610_s11 = scalar_lea.vmem %s3609_s17, 2048  ;;  %p3611_p6 = scmp.lt.s32.totalorder %s3890_s6, %s3609_s17 }
  0x40   : > { %p3606_p5 = pnand %p3604_p1, %p3592_p7  ;;  %p3612_p3 = scmp.lt.s32.totalorder %s3610_s11, %s3603_s8 }
  0x42   : > { %p3607_p2 = pneg %p3606_p5  ;;  %p3613_p4 = por %p3612_p3, %p3611_p6 }
  0x44   : > { %p3614_p10 = pnand %p3613_p4, %p3607_p2 }
  0x46   : > { %3617 = shalt.err (!%p3614_p10)
}
  0x47   : > { %s4793_s12 = scalar_lea.sflag [#allocation3], %s3877_s15  ;;  %s3004_s23 = sshll.u32 %s3877_s15, 7 }
  0x48   : > { %3403 = dma.hbm_to_vmem [thread:$0]  (!%p3886_p11), %s3884_s28, 1024, %s3890_s6, %s4793_s12, %s3751_s9, %s3751_s9, %s3752_s10  }
  0x49   : > { %s3073_s27 = sshll.u32 %s3748_s21, 11  ;;  %s233_s16 = scalar_lea.vmem [#allocation5], %s3004_s23 }
  0x4a   : > { %s3928_s29 = scalar_lea.hbm %s4773_s1, %s3073_s27  ;;  %s241_s17 = sshll.u32 %s233_s16, 4  ;;  %s3930_s17 = int_to_ptr.vmem [resolvable:$true] %s241_s17 }
  0x4b   : > { %s4794_s0 = sand.u32 1, %s3748_s21   ;;  %s3618_s13 = scalar_lea.hbm %s3928_s29, 2048 }
  0x4c   : > { %s230_s2 = scalar_lea.sflag [#allocation6], %s4794_s0  ;;  %p3619_p1 = scmp.ne.s32.totalorder %s3928_s29, %s3618_s13 }
  0x4d   : > { %s3623_s6 = scalar_lea.hbm %s4773_s1, 4096  ;;  %p3624_p3 = scmp.lt.s32.totalorder %s3928_s29, %s4773_s1 }
  0x4e   : > { %p3621_p4 = pnand %p3619_p1, %p3592_p7  ;;  %p3625_p9 = scmp.lt.s32.totalorder %s3623_s6, %s3618_s13 }
  0x50   : > { %p3622_p6 = pneg %p3621_p4  ;;  %p3626_p12 = por %p3625_p9, %p3624_p3 }
  0x52   : > { %p3627_p13 = pnand %p3626_p12, %p3622_p6 }
  0x54   : > { %3630 = shalt.err (!%p3627_p13)
}
  0x55   : > { %s3631_s0 = scalar_lea.vmem %s3930_s17, 2048  ;;  %s3754_s23 = smov [#allocation5]  }
  0x56   : > { %p3632_p0 = scmp.ne.s32.totalorder %s3930_s17, %s3631_s0  ;;  %s3636_s8 = sshll.u32 %s3754_s23, 4  ;;  %s3637_s8 = int_to_ptr.vmem [resolvable:$false] %s3636_s8 }
  0x57   : > { %s3638_s11 = scalar_lea.vmem %s3637_s8, 4096  ;;  %p3639_p10 = scmp.lt.s32.totalorder %s3930_s17, %s3637_s8 }
  0x58   : > { %p3634_p5 = pnand %p3632_p0, %p3592_p7  ;;  %p3640_p1 = scmp.lt.s32.totalorder %s3638_s11, %s3631_s0 }
  0x5a   : > { %p3635_p2 = pneg %p3634_p5  ;;  %p3641_p4 = por %p3640_p1, %p3639_p10 }
  0x5c   : > { %p3642_p3 = pnand %p3641_p4, %p3635_p2 }
  0x5e   : > { %3645 = shalt.err (!%p3642_p3)
}
  0x5f   : > { %3406 = dma.hbm_to_vmem [thread:$0]  (!%p3886_p11), %s3928_s29, 2048, %s3930_s17, %s230_s2, %s3751_s9, %s3751_s9, %s3752_s10  }
  0x60   : > { %253 = sbr.rel (%p3834_p8) target bundleno = 1268 (0x4f4), region = 36  ;;  %s3962_s13 = sand.u32 (!%p3834_p8), 1, %s3740_s19  }
  0x61   : > { %s3009_s16 = sshll.u32 (!%p3834_p8), %s3962_s13, 6  ;;  %s256_s15 = scalar_lea.sflag (!%p3834_p8), [#allocation3], %s3962_s13 }
  0x62   : > { %s3966_s28 = scalar_lea.vmem (!%p3834_p8), [#allocation2], %s3009_s16  ;;  %p4795_p7 = scmp.ne.s32.totalorder (!%p3834_p8), %s4783_s24, 0 }
  0x65   : > { %3715 = dma.done.wait (%p4795_p7), %s256_s15, 1024  }
  0x66   : > { %3717 = vsyncadd (%p4795_p7), %s256_s15, 4294966272  ;;  %s264_s2 = sand.u32 1, %s3815_s22   ;;  %s3010_s26 = sshll.u32 %s3962_s13, 7 }
  0x67   : > { %s265_s9 = scalar_lea.sflag [#allocation6], %s264_s2  ;;  %s3974_s10 = scalar_lea.vmem [#allocation5], %s3010_s26 }
  0x68   : > { %3719 = dma.done.wait (%p4795_p7), %s265_s9, 2048  }
  0x69   : > { %3721 = vsyncadd (%p4795_p7), %s265_s9, 4294965248  ;;  %p4796_p8 = scmp.eq.s32.totalorder %s3815_s22, 0 }
  0x6b   : > { %3723 = dma.done.wait (%p4796_p8), [#allocation6], 512   ;;  %p4797_p11 = pmov %p4796_p8 }
  0x6c   : > { %v338_v0 = vld [vmem:[#allocation7 + $0x10] sm:$0xff]  ;;  %v339_v1 = vld [vmem:[#allocation7 + $0x18] sm:$0xff]  ;;  %v336_v2 = vld [vmem:[#allocation7] sm:$0xff]  ;;  %vm385_vm0 = vcmask 261120   ;;  %v3755_v42 = vmov 0.0   ;;  %vm3756_vm1 = vmmov 0  }
  0x6d   : > { %3725 = vsyncadd (%p4797_p11), [#allocation6], 4294966784  ;;  %v341_v3 = vpack.c.bf16 %v339_v1, %v338_v0  ;;  %v337_v4 = vld [vmem:[#allocation7 + $0x8] sm:$0xff]  ;;  %v320_v5 = vld [vmem:[%s3974_s10] sm:$0xff]  ;;  %vm1320_vm2 = vcmask 130048   ;;  %vm1761_vm3 = vcmask 64512  }
  0x6e   : > { %v321_v6 = vld [vmem:[%s3974_s10 + $0x8] sm:$0xff]  ;;  %v340_v7 = vpack.c.bf16 %v337_v4, %v336_v2  ;;  %v322_v9 = vld [vmem:[%s3974_s10 + $0x10] sm:$0xff]  ;;  %v323_v10 = vld [vmem:[%s3974_s10 + $0x18] sm:$0xff]  ;;  %vm1949_vm4 = vcmask 1043456   ;;  %s3759_s29 = smov 32   ;;  %s3760_s17 = smov 64  }
  0x6f   : > { %v3986_v8 = vpack.c.bf16 %v321_v6, %v320_v5  ;;  %3172 = vmatprep.subr.bf16.mxu1 %v341_v3  ;;  %3160 = vmatprep.subr.bf16.mxu0 %v341_v3  ;;  %v324_v11 = vld [vmem:[%s3974_s10 + $0x20] sm:$0xff]  ;;  %v313_v13 = vld [vmem:[%s3966_s28 + $0x8] sm:$0xff]  ;;  %v314_v16 = vld [vmem:[%s3966_s28 + $0x10] sm:$0xff]  ;;  %v3999_v19 = vpack.c.bf16 %v323_v10, %v322_v9  ;;  %s3761_s6 = smov 96   ;;  %s3012_s12 = sshll.u32 %s3962_s13, 4  ;;  %vm2484_vm5 = vcmask 523264  }
  0x70   : > { %3173 = vmatpush3.bf16.msra.mxu1 %v341_v3  ;;  %v312_v12 = vld [vmem:[%s3966_s28] sm:$0xff]  ;;  %3161 = vmatpush3.bf16.msra.mxu0 %v341_v3  ;;  %v325_v14 = vld [vmem:[%s3974_s10 + $0x28] sm:$0xff]  ;;  %v315_v17 = vld [vmem:[%s3966_s28 + $0x18] sm:$0xff]  ;;  %vm2486_vm6 = vcmask 785408   ;;  %s301_s27 = scalar_lea.vmem [#allocation8], %s3012_s12  ;;  %s3078_s23 = sshll.u32 %s3815_s22, 8 }
  0x71   : > { %3176 = vmatprep.mubr.msk.bf16.mxu1 %vm385_vm0, %v3986_v8  ;;  %3174 = vmatprep.subr.bf16.mxu1 %v340_v7  ;;  %v3074_v15 = vpack.c.bf16 %v313_v13, %v312_v12  ;;  %v316_v18 = vld [vmem:[%s3966_s28 + $0x20] sm:$0xff]  ;;  %v317_v20 = vld [vmem:[%s3966_s28 + $0x28] sm:$0xff]  ;;  %v4003_v21 = vpack.c.bf16 %v325_v14, %v324_v11  ;;  %v3075_v22 = vpack.c.bf16 %v315_v17, %v314_v16  ;;  %v326_v24 = vld [vmem:[%s3974_s10 + $0x30] sm:$0xff]  ;;  %s2849_s0 = sshll.u32 %s301_s27, 4  ;;  %s4680_s16 = scalar_lea.hbm %s4776_s4, %s3078_s23  ;;  %s4682_s0 = int_to_ptr.vmem [resolvable:$true] %s2849_s0 }
  0x72   : > { %3162 = vmatprep.subr.bf16.mxu0 %v340_v7  ;;  %v3076_v23 = vpack.c.bf16 %v317_v20, %v316_v18  ;;  %v327_v25 = vld [vmem:[%s3974_s10 + $0x38] sm:$0xff]  ;;  %v328_v26 = vld [vmem:[%s3974_s10 + $0x40] sm:$0xff]  ;;  %v329_v27 = vld [vmem:[%s3974_s10 + $0x48] sm:$0xff]  ;;  %s2830_s15 = scalar_lea.sflag [#allocation4], %s3962_s13  ;;  %p4798_p9 = scmp.ne.s32.totalorder %s4790_s14, 0 }
  0x73   : > { %3164 = vmatprep.mubr.msk.bf16.mxu0 %vm385_vm0, %v3074_v15  ;;  %v318_v28 = vld [vmem:[%s3966_s28 + $0x30] sm:$0xff]  ;;  %v319_v29 = vld [vmem:[%s3966_s28 + $0x38] sm:$0xff]  ;;  %v4017_v30 = vpack.c.bf16 %v327_v25, %v326_v24  ;;  %v4019_v31 = vpack.c.bf16 %v329_v27, %v328_v26  ;;  %v332_v35 = vld [vmem:[%s3974_s10 + $0x60] sm:$0xff]  ;;  %s3762_s2 = smov [#allocation8]  }
  0x74   : > { %3175 = vmatpush3.bf16.msra.mxu1 %v340_v7  ;;  %3163 = vmatpush3.bf16.msra.mxu0 %v340_v7  ;;  %v3077_v32 = vpack.c.bf16 %v319_v29, %v318_v28  ;;  %v330_v33 = vld [vmem:[%s3974_s10 + $0x50] sm:$0xff]  ;;  %v331_v34 = vld [vmem:[%s3974_s10 + $0x58] sm:$0xff]  ;;  %v333_v36 = vld [vmem:[%s3974_s10 + $0x68] sm:$0xff]  ;;  %s3650_s26 = sshll.u32 %s3762_s2, 4  ;;  %s3651_s26 = int_to_ptr.vmem [resolvable:$false] %s3650_s26 }
  0x75   : > { %v4030_v37 = vpack.c.bf16 %v331_v34, %v330_v33  ;;  %v4032_v38 = vpack.c.bf16 %v333_v36, %v332_v35  ;;  %v334_v39 = vld [vmem:[%s3974_s10 + $0x70] sm:$0xff]  ;;  %v335_v40 = vld [vmem:[%s3974_s10 + $0x78] sm:$0xff]  ;;  %3192 = vmatprep.subr.bf16.mxu0 %v3755_v42  ;;  %3210 = vmatprep.subr.bf16.mxu1 %v3755_v42  ;;  %v4055_v47 = vld [vmem:[%s4775_s3] ss:$0 sm:$0xff]  ;;  %s3652_s9 = scalar_lea.vmem %s3651_s26, 512  ;;  %p3653_p0 = scmp.lt.s32.totalorder %s4682_s0, %s3651_s26 }
  0x76   : > { %v4040_v41 = vpack.c.bf16 %v335_v40, %v334_v39 }
  0x77   : > { %3177 = vmatmul.mubr.msk.bf16.vlgmr.msra.gmra.mxu1 %vm385_vm0, %v3999_v19  ;;  %3165 = vmatmul.mubr.msk.bf16.vlgmr.msra.gmra.mxu0 %vm385_vm0, %v3075_v22 }
  0x78   : > { %3180 = vmatprep.mubr.msk.bf16.mxu1 %vm385_vm0, %v4003_v21  ;;  %3168 = vmatprep.mubr.msk.bf16.mxu0 %vm385_vm0, %v3076_v23 }
  0x7f   : > { %3181 = vmatmul.mubr.msk.bf16.gmra.mxu1 %vm385_vm0, %v4017_v30  ;;  %3169 = vmatmul.mubr.msk.bf16.gmra.mxu0 %vm385_vm0, %v3077_v32 }
  0x80   : > { %3184 = vmatprep.mubr.msk.bf16.mxu1 %vm385_vm0, %v4019_v31  ;;  %3194 = vmatprep.mubr.msk.bf16.mxu0 %vm3756_vm1, %v3755_v42 }
  0x87   : > { %3185 = vmatmul.mubr.msk.bf16.gmra.mxu1 %vm385_vm0, %v4030_v37 }
  0x88   : > { %3188 = vmatprep.mubr.msk.bf16.mxu1 %vm385_vm0, %v4032_v38 }
  0x8f   : > { %3189 = vmatmul.mubr.msk.bf16.gmra.mxu1 %vm385_vm0, %v4040_v41 }
  0x90   : > { %3212 = vmatprep.mubr.msk.bf16.mxu1 %vm3756_vm1, %v3755_v42 }
 0x137   : > { %v3178_v43 = vpop.f32.mrf.mxu1  ;;  %v4050_v44 = vpop.f32.mrf.mxu0 }
 0x138   : > { %v546_v60 = vadd.f32 %v3178_v43, %v4055_v47 }
 0x139   : > { %v537_v45 = vpop.f32.mrf.mxu1  ;;  %v432_v46 = vpop.f32.mrf.mxu0 }
 0x13a   : > { %v538_v49 = vadd.f32 %v4055_v47, %v537_v45  ;;  %v433_v63 = vadd.f32 %v4055_v47, %v432_v46  ;;  %v602_v6 = vmax.f32 %v546_v60, 0.0 }
 0x13b   : > { %v3179_v48 = vpop.f32.mrf.mxu1  ;;  %v3167_v50 = vpop.f32.mrf.mxu0 }
 0x13c   : > { %v549_v54 = vadd.f32 %v3179_v48, %v4055_v47  ;;  %v600_v56 = vmax.f32 %v538_v49, 0.0  ;;  %v463_v10 = vmax.f32 %v433_v63, 0.0  ;;  %v444_v13 = vadd.f32 %v3167_v50, %v4055_v47 }
 0x13d   : > { %v540_v51 = vpop.f32.mrf.mxu1  ;;  %v435_v53 = vpop.f32.mrf.mxu0 }
 0x13e   : > { %v541_v52 = vadd.f32 %v4055_v47, %v540_v51  ;;  %v603_v0 = vmax.f32 %v549_v54, 0.0  ;;  %v4081_v22 = vpack.c.bf16 %v463_v10, %v463_v10  ;;  %v436_v23 = vadd.f32 %v4055_v47, %v435_v53 }
 0x13f   : > { %v3182_v55 = vpop.f32.mrf.mxu1  ;;  %v4061_v59 = vpop.f32.mrf.mxu0  ;;  %v466_v25 = vmax.f32 %v444_v13, 0.0  ;;  %v441_v53 = vadd.f32 %v4050_v44, %v4055_v47 }
 0x140   : > { %v601_v57 = vmax.f32 %v541_v52, 0.0  ;;  %v562_v58 = vadd.f32 %v3182_v55, %v4055_v47  ;;  %v4073_v11 = vpack.c.bf16 %v603_v0, %v602_v6  ;;  %v464_v36 = vmax.f32 %v436_v23, 0.0 }
 0x141   : > { %v553_v61 = vpop.f32.mrf.mxu1  ;;  %v4067_v2 = vpop.f32.mrf.mxu0  ;;  %v4096_v43 = vpack.c.bf16 %v466_v25, %v466_v25  ;;  %v457_v25 = vadd.f32 %v4061_v59, %v4055_v47 }
 0x142   : > { %v4064_v62 = vpack.c.bf16 %v601_v57, %v600_v56  ;;  %v606_v3 = vmax.f32 %v562_v58, 0.0  ;;  %v554_v15 = vadd.f32 %v4055_v47, %v553_v61  ;;  %v674_v27 = vsel %vm385_vm0, %v4073_v11, 0 }
 0x143   : > { %v3183_v1 = vpop.f32.mrf.mxu1  ;;  %v3171_v14 = vpop.f32.mrf.mxu0  ;;  %v472_v54 = vpack.c.bf16 %v464_v36, %v464_v36  ;;  %v449_v13 = vadd.f32 %v4055_v47, %v4067_v2 }
 0x144   : > { %v565_v4 = vadd.f32 %v3183_v1, %v4055_v47  ;;  %v628_v5 = vsel %vm385_vm0, %v4064_v62, 0  ;;  %v604_v29 = vmax.f32 %v554_v15, 0.0  ;;  %v465_v1 = vmax.f32 %v441_v53, 0.0 }
 0x145   : > { %v556_v7 = vpop.f32.mrf.mxu1  ;;  %3193 = vmatpush3.bf16.xpose.msra.mxu0 %v628_v5  ;;  %v451_v28 = vpop.f32.mrf.mxu0  ;;  %v460_v5 = vadd.f32 %v3171_v14, %v4055_v47  ;;  %v467_v2 = vmax.f32 %v449_v13, 0.0 }
 0x146   : > { %v607_v9 = vmax.f32 %v565_v4, 0.0  ;;  %3198 = vmatprep.subr.bf16.mxu0 %v3755_v42  ;;  %v557_v17 = vadd.f32 %v4055_v47, %v556_v7  ;;  %v452_v40 = vadd.f32 %v4055_v47, %v451_v28 }
 0x147   : > { %v3186_v12 = vpop.f32.mrf.mxu1  ;;  %v470_v14 = vmax.f32 %v460_v5, 0.0 }
 0x148   : > { %v4077_v16 = vpack.c.bf16 %v607_v9, %v606_v3  ;;  %v578_v18 = vadd.f32 %v3186_v12, %v4055_v47  ;;  %v605_v32 = vmax.f32 %v557_v17, 0.0  ;;  %v468_v55 = vmax.f32 %v452_v40, 0.0 }
 0x149   : > { %v569_v20 = vpop.f32.mrf.mxu1  ;;  %v473_v12 = vpack.c.bf16 %v465_v1, %v465_v1  ;;  %v478_v23 = vpack.c.bf16 %v470_v14, %v470_v14 }
 0x14a   : > { %v766_v24 = vsel %vm385_vm0, %v4077_v16, 0  ;;  %v610_v33 = vmax.f32 %v578_v18, 0.0  ;;  %v570_v45 = vadd.f32 %v4055_v47, %v569_v20  ;;  %v4099_v48 = vpack.c.bf16 %v605_v32, %v604_v29 }
 0x14b   : > { %v3187_v26 = vpop.f32.mrf.mxu1  ;;  %3211 = vmatpush3.bf16.xpose.msra.mxu1 %v766_v24  ;;  %v476_v3 = vpack.c.bf16 %v468_v55, %v468_v55  ;;  %v763_v29 = vsel %vm385_vm0, %v4096_v43, 0  ;;  %v625_v32 = vsel %vm385_vm0, %v4081_v22, 0 }
 0x14c   : > { %v581_v34 = vadd.f32 %v3187_v26, %v4055_v47  ;;  %3195 = vmatmul.mubr.msk.bf16.vlgmr.msra.gmra.mxu0 %vm385_vm0, %v4081_v22  ;;  %3222 = vmatprep.subr.bf16.mxu1 %v3755_v42  ;;  %v608_v57 = vmax.f32 %v570_v45, 0.0  ;;  %v720_v44 = vsel %vm385_vm0, %v4099_v48, 0  ;;  %v475_v26 = vpack.c.bf16 %v467_v2, %v467_v2 }
 0x14d   : > { %v572_v35 = vpop.f32.mrf.mxu1  ;;  %3199 = vmatpush3.bf16.xpose.msra.mxu0 %v674_v27  ;;  %3200 = vmatprep.mubr.msk.bf16.mxu0 %vm3756_vm1, %v3755_v42  ;;  %v671_v27 = vsel %vm385_vm0, %v472_v54, 0  ;;  %v717_v22 = vsel %vm385_vm0, %v473_v12, 0 }
 0x14e   : > { %v611_v39 = vmax.f32 %v581_v34, 0.0  ;;  %3204 = vmatprep.subr.bf16.mxu0 %v3755_v42  ;;  %v573_v50 = vadd.f32 %v4055_v47, %v572_v35 }
 0x14f   : > { %v3190_v46 = vpop.f32.mrf.mxu1 }
 0x150   : > { %v4101_v49 = vpack.c.bf16 %v611_v39, %v610_v33  ;;  %v594_v51 = vadd.f32 %v3190_v46, %v4055_v47  ;;  %v609_v60 = vmax.f32 %v573_v50, 0.0 }
 0x151   : > { %v585_v52 = vpop.f32.mrf.mxu1 }
 0x152   : > { %3213 = vmatmul.mubr.msk.bf16.vlgmr.msra.gmra.mxu1 %vm385_vm0, %v4096_v43  ;;  %v858_v56 = vsel %vm385_vm0, %v4101_v49, 0  ;;  %v614_v61 = vmax.f32 %v594_v51, 0.0  ;;  %v4122_v6 = vpack.c.bf16 %v609_v60, %v608_v57  ;;  %v586_v7 = vadd.f32 %v4055_v47, %v585_v52 }
 0x153   : > { %v3191_v58 = vpop.f32.mrf.mxu1  ;;  %3223 = vmatpush3.bf16.xpose.msra.mxu1 %v858_v56  ;;  %3224 = vmatprep.mubr.msk.bf16.mxu1 %vm3756_vm1, %v3755_v42 }
 0x154   : > { %v597_v63 = vadd.f32 %v3191_v58, %v4055_v47  ;;  %3201 = vmatmul.mubr.msk.bf16.vlgmr.msra.gmra.mxu0 %vm385_vm0, %v472_v54  ;;  %3234 = vmatprep.subr.bf16.mxu1 %v3755_v42  ;;  %v612_v17 = vmax.f32 %v586_v7, 0.0  ;;  %v812_v20 = vsel %vm385_vm0, %v4122_v6, 0 }
 0x155   : > { %3205 = vmatpush3.bf16.xpose.msra.mxu0 %v720_v44  ;;  %3206 = vmatprep.mubr.msk.bf16.mxu0 %vm3756_vm1, %v3755_v42  ;;  %v588_v0 = vpop.f32.mrf.mxu1 }
 0x156   : > { %v615_v4 = vmax.f32 %v597_v63, 0.0  ;;  %3216 = vmatprep.subr.bf16.mxu0 %v3755_v42  ;;  %v589_v10 = vadd.f32 %v4055_v47, %v588_v0  ;;  %v469_v47 = vmax.f32 %v457_v25, 0.0 }
 0x158   : > { %v4125_v9 = vpack.c.bf16 %v615_v4, %v614_v61  ;;  %v613_v18 = vmax.f32 %v589_v10, 0.0  ;;  %v477_v59 = vpack.c.bf16 %v469_v47, %v469_v47 }
 0x15a   : > { %3225 = vmatmul.mubr.msk.bf16.vlgmr.msra.gmra.mxu1 %vm385_vm0, %v476_v3  ;;  %v950_v15 = vsel %vm385_vm0, %v4125_v9, 0  ;;  %v622_v24 = vpack.c.bf16 %v613_v18, %v612_v17  ;;  %v901_v33 = vsel %vm385_vm0, %v477_v59, 0 }
 0x15b   : > { %3235 = vmatpush3.bf16.xpose.msra.mxu1 %v950_v15  ;;  %3236 = vmatprep.mubr.msk.bf16.mxu1 %vm3756_vm1, %v3755_v42 }
 0x15c   : > { %3207 = vmatmul.mubr.msk.bf16.vlgmr.msra.gmra.mxu0 %vm385_vm0, %v473_v12  ;;  %3246 = vmatprep.subr.bf16.mxu1 %v3755_v42  ;;  %v904_v28 = vsel %vm385_vm0, %v622_v24, 0 }
 0x15d   : > { %3217 = vmatpush3.bf16.xpose.msra.mxu0 %v812_v20  ;;  %3218 = vmatprep.mubr.msk.bf16.mxu0 %vm3756_vm1, %v3755_v42 }
 0x15e   : > { %3228 = vmatprep.subr.bf16.mxu0 %v3755_v42 }
 0x162   : > { %3237 = vmatmul.mubr.msk.bf16.vlgmr.msra.gmra.mxu1 %vm385_vm0, %v478_v23 }
 0x163   : > { %3247 = vmatpush3.bf16.xpose.msra.mxu1 %v671_v27  ;;  %3248 = vmatprep.mubr.msk.bf16.mxu1 %vm3756_vm1, %v3755_v42 }
 0x164   : > { %3219 = vmatmul.mubr.msk.bf16.vlgmr.msra.gmra.mxu0 %vm385_vm0, %v475_v26  ;;  %3258 = vmatprep.subr.bf16.mxu1 %v3755_v42 }
 0x165   : > { %3229 = vmatpush3.bf16.xpose.msra.mxu0 %v904_v28  ;;  %3230 = vmatprep.mubr.msk.bf16.mxu0 %vm3756_vm1, %v3755_v42 }
 0x166   : > { %3240 = vmatprep.subr.bf16.mxu0 %v3755_v42 }
 0x16a   : > { %3249 = vmatmul.mubr.msk.bf16.vlgmr.msra.gmra.mxu1 %vm385_vm0, %v4073_v11  ;;  %v855_v11 = vsel %vm385_vm0, %v476_v3, 0 }
 0x16b   : > { %3259 = vmatpush3.bf16.xpose.msra.mxu1 %v763_v29  ;;  %3260 = vmatprep.mubr.msk.bf16.mxu1 %vm3756_vm1, %v3755_v42 }
 0x16c   : > { %3231 = vmatmul.mubr.msk.bf16.vlgmr.msra.gmra.mxu0 %vm385_vm0, %v477_v59  ;;  %3270 = vmatprep.subr.bf16.mxu1 %v3755_v42 }
 0x16d   : > { %3241 = vmatpush3.bf16.xpose.msra.mxu0 %v625_v32  ;;  %3242 = vmatprep.mubr.msk.bf16.mxu0 %vm3756_vm1, %v3755_v42 }
 0x16e   : > { %3252 = vmatprep.subr.bf16.mxu0 %v3755_v42 }
 0x172   : > { %3261 = vmatmul.mubr.msk.bf16.vlgmr.msra.gmra.mxu1 %vm385_vm0, %v4077_v16  ;;  %v947_v16 = vsel %vm385_vm0, %v478_v23, 0 }
 0x173   : > { %3271 = vmatpush3.bf16.xpose.msra.mxu1 %v855_v11  ;;  %3272 = vmatprep.mubr.msk.bf16.mxu1 %vm3756_vm1, %v3755_v42 }
 0x174   : > { %3243 = vmatmul.mubr.msk.bf16.vlgmr.msra.gmra.mxu0 %vm385_vm0, %v4064_v62  ;;  %3282 = vmatprep.subr.bf16.mxu1 %v3755_v42  ;;  %v809_v62 = vsel %vm385_vm0, %v475_v26, 0 }
 0x175   : > { %3253 = vmatpush3.bf16.xpose.msra.mxu0 %v717_v22  ;;  %3254 = vmatprep.mubr.msk.bf16.mxu0 %vm3756_vm1, %v3755_v42 }
 0x176   : > { %3264 = vmatprep.subr.bf16.mxu0 %v3755_v42 }
 0x17a   : > { %3273 = vmatmul.mubr.msk.bf16.vlgmr.msra.gmra.mxu1 %vm385_vm0, %v4101_v49 }
 0x17b   : > { %3283 = vmatpush3.bf16.xpose.msra.mxu1 %v947_v16  ;;  %3284 = vmatprep.mubr.msk.bf16.mxu1 %vm3756_vm1, %v3755_v42 }
 0x17c   : > { %3255 = vmatmul.mubr.msk.bf16.vlgmr.msra.gmra.mxu0 %vm385_vm0, %v4099_v48  ;;  %3294 = vmatprep.subr.bf16.mxu1 %v3755_v42 }
 0x17d   : > { %3265 = vmatpush3.bf16.xpose.msra.mxu0 %v809_v62  ;;  %3266 = vmatprep.mubr.msk.bf16.mxu0 %vm3756_vm1, %v3755_v42 }
 0x17e   : > { %3276 = vmatprep.subr.bf16.mxu0 %v3755_v42 }
 0x182   : > { %3285 = vmatmul.mubr.msk.bf16.vlgmr.msra.gmra.mxu1 %vm385_vm0, %v4125_v9 }
 0x183   : > { %3295 = vmatpush3.bf16.msra.mxu1 %v3999_v19  ;;  %3296 = vmatprep.mubr.msk.bf16.mxu1 %vm3756_vm1, %v3755_v42 }
 0x184   : > { %3267 = vmatmul.mubr.msk.bf16.vlgmr.msra.gmra.mxu0 %vm385_vm0, %v4122_v6  ;;  %3306 = vmatprep.subr.bf16.mxu1 %v3755_v42 }
 0x185   : > { %3277 = vmatpush3.bf16.xpose.msra.mxu0 %v901_v33  ;;  %3278 = vmatprep.mubr.msk.bf16.mxu0 %vm3756_vm1, %v3755_v42 }
 0x186   : > { %3288 = vmatprep.subr.bf16.mxu0 %v3755_v42 }
 0x18c   : > { %3279 = vmatmul.mubr.msk.bf16.vlgmr.msra.gmra.mxu0 %vm385_vm0, %v622_v24 }
 0x18d   : > { %3289 = vmatpush3.bf16.msra.mxu0 %v3986_v8  ;;  %3290 = vmatprep.mubr.msk.bf16.mxu0 %vm3756_vm1, %v3755_v42 }
 0x18e   : > { %3300 = vmatprep.subr.bf16.mxu0 %v3755_v42 }
 0x20c   : > { %v4208_v19 = vpop.f32.mrf.mxu0 }
 0x20d   : > { %v1321_v34 = vsel %vm1320_vm2, %v4208_v19, -inf }
 0x20e   : > { %1322 = vmax.xlane.f32.xlu0 %v1321_v34  ;;  %v3196_v35 = vpop.f32.mrf.mxu0 }
 0x210   : > { %v667_v36 = vpop.f32.mrf.mxu0 }
 0x212   : > { %v3197_v39 = vpop.f32.mrf.mxu0  ;;  %v4212_v40 = vpop.f32.mrf.mxu1 }
 0x213   : > { %v1330_v61 = vsel %vm1320_vm2, %v4212_v40, -inf }
 0x214   : > { %v4214_v43 = vpop.f32.mrf.mxu0  ;;  %v3214_v8 = vpop.f32.mrf.mxu1 }
 0x215   : > { %v1324_v45 = vsel %vm1320_vm2, %v4214_v43, -inf }
 0x216   : > { %v805_v46 = vpop.f32.mrf.mxu1  ;;  %1325 = vmax.xlane.f32.xlu0 %v1324_v45  ;;  %v3202_v48 = vpop.f32.mrf.mxu0 }
 0x218   : > { %v713_v49 = vpop.f32.mrf.mxu0  ;;  %v3215_v50 = vpop.f32.mrf.mxu1 }
 0x21a   : > { %v3203_v51 = vpop.f32.mrf.mxu0  ;;  %v4218_v52 = vpop.f32.mrf.mxu1 }
 0x21b   : > { %v1336_v3 = vsel %vm1320_vm2, %v4218_v52, -inf }
 0x21c   : > { %v4220_v53 = vpop.f32.mrf.mxu0  ;;  %v3226_v54 = vpop.f32.mrf.mxu1 }
 0x21d   : > { %v1327_v55 = vsel %vm1320_vm2, %v4220_v53, -inf }
 0x21e   : > { %v897_v56 = vpop.f32.mrf.mxu1  ;;  %1328 = vmax.xlane.f32.xlu1 %v1327_v55  ;;  %v3208_v57 = vpop.f32.mrf.mxu0 }
 0x220   : > { %v759_v58 = vpop.f32.mrf.mxu0  ;;  %v3227_v60 = vpop.f32.mrf.mxu1 }
 0x222   : > { %v4226_v63 = vpop.f32.mrf.mxu1  ;;  %1331 = vmax.xlane.f32.xlu1 %v1330_v61  ;;  %v3209_v44 = vpop.f32.mrf.mxu0 }
 0x223   : > { %v1342_v10 = vsel %vm1320_vm2, %v4226_v63, -inf }
 0x224   : > { %v4228_v0 = vpop.f32.mrf.mxu0  ;;  %v3238_v1 = vpop.f32.mrf.mxu1 }
 0x225   : > { %v1333_v4 = vsel %vm1320_vm2, %v4228_v0, -inf }
 0x226   : > { %v989_v5 = vpop.f32.mrf.mxu1  ;;  %1337 = vmax.xlane.f32.xlu1 %v1336_v3  ;;  %1334 = vmax.xlane.f32.xlu0 %v1333_v4  ;;  %v3220_v6 = vpop.f32.mrf.mxu0 }
 0x228   : > { %v851_v7 = vpop.f32.mrf.mxu0  ;;  %v3239_v9 = vpop.f32.mrf.mxu1 }
 0x22a   : > { %v4236_v12 = vpop.f32.mrf.mxu1  ;;  %1343 = vmax.xlane.f32.xlu1 %v1342_v10  ;;  %v3221_v13 = vpop.f32.mrf.mxu0 }
 0x22b   : > { %v1768_v25 = vsel %vm1761_vm3, %v4236_v12, -inf }
 0x22c   : > { %v4238_v15 = vpop.f32.mrf.mxu0  ;;  %v3250_v14 = vpop.f32.mrf.mxu1 }
 0x22d   : > { %v1339_v17 = vsel %vm1320_vm2, %v4238_v15, -inf }
 0x22e   : > { %v4242_v18 = vpop.f32.mrf.mxu1  ;;  %1340 = vmax.xlane.f32.xlu0 %v1339_v17  ;;  %v3232_v20 = vpop.f32.mrf.mxu0 }
 0x22f   : > { %v1771_v2 = vsel %vm1761_vm3, %v4242_v18, -inf }
 0x230   : > { %v3251_v23 = vpop.f32.mrf.mxu1  ;;  %1772 = vmax.xlane.f32.xlu1 %v1771_v2  ;;  %v943_v24 = vpop.f32.mrf.mxu0 }
 0x232   : > { %v4248_v26 = vpop.f32.mrf.mxu1  ;;  %1769 = vmax.xlane.f32.xlu0 %v1768_v25  ;;  %v3233_v27 = vpop.f32.mrf.mxu0 }
 0x233   : > { %v1780_v16 = vsel %vm1761_vm3, %v4248_v26, -inf }
 0x234   : > { %v4250_v28 = vpop.f32.mrf.mxu0  ;;  %v3262_v47 = vpop.f32.mrf.mxu1 }
 0x235   : > { %v1762_v59 = vsel %vm1761_vm3, %v4250_v28, -inf }
 0x236   : > { %v4254_v29 = vpop.f32.mrf.mxu1  ;;  %1763 = vmax.xlane.f32.xlu0 %v1762_v59  ;;  %v3244_v32 = vpop.f32.mrf.mxu0 }
 0x237   : > { %v1783_v39 = vsel %vm1761_vm3, %v4254_v29, -inf }
 0x238   : > { %v4256_v11 = vpop.f32.mrf.mxu0  ;;  %v3263_v22 = vpop.f32.mrf.mxu1 }
 0x239   : > { %v1765_v62 = vsel %vm1761_vm3, %v4256_v11, -inf }
 0x23a   : > { %v4262_v33 = vpop.f32.mrf.mxu1  ;;  %1781 = vmax.xlane.f32.xlu0 %v1780_v16  ;;  %1766 = vmax.xlane.f32.xlu1 %v1765_v62  ;;  %v3245_v34 = vpop.f32.mrf.mxu0 }
 0x23b   : > { %v1792_v50 = vsel %vm1761_vm3, %v4262_v33, -inf }
 0x23c   : > { %v4264_v35 = vpop.f32.mrf.mxu0  ;;  %v3274_v36 = vpop.f32.mrf.mxu1 }
 0x23d   : > { %v1774_v8 = vsel %vm1761_vm3, %v4264_v35, -inf }
 0x23e   : > { %v4270_v45 = vpop.f32.mrf.mxu1  ;;  %1784 = vmax.xlane.f32.xlu1 %v1783_v39  ;;  %1775 = vmax.xlane.f32.xlu0 %v1774_v8  ;;  %v3256_v46 = vpop.f32.mrf.mxu0 }
 0x23f   : > { %v1795_v58 = vsel %vm1761_vm3, %v4270_v45, -inf }
 0x240   : > { %v4272_v48 = vpop.f32.mrf.mxu0  ;;  %v3275_v49 = vpop.f32.mrf.mxu1 }
 0x241   : > { %v1777_v51 = vsel %vm1761_vm3, %v4272_v48, -inf }
 0x242   : > { %v4278_v54 = vpop.f32.mrf.mxu1  ;;  %1793 = vmax.xlane.f32.xlu0 %v1792_v50  ;;  %1778 = vmax.xlane.f32.xlu1 %v1777_v51  ;;  %v3257_v55 = vpop.f32.mrf.mxu0 }
 0x243   : > { %v1804_v13 = vsel %vm1761_vm3, %v4278_v54, -inf }
 0x244   : > { %v4280_v56 = vpop.f32.mrf.mxu0  ;;  %v3286_v57 = vpop.f32.mrf.mxu1 }
 0x245   : > { %v1786_v60 = vsel %vm1761_vm3, %v4280_v56, -inf }
 0x246   : > { %v4286_v61 = vpop.f32.mrf.mxu1  ;;  %1796 = vmax.xlane.f32.xlu1 %v1795_v58  ;;  %1787 = vmax.xlane.f32.xlu0 %v1786_v60  ;;  %v3268_v44 = vpop.f32.mrf.mxu0 }
 0x247   : > { %v1807_v20 = vsel %vm1761_vm3, %v4286_v61, -inf }
 0x248   : > { %v4288_v1 = vpop.f32.mrf.mxu0  ;;  %v3287_v3 = vpop.f32.mrf.mxu1 }
 0x249   : > { %v1789_v4 = vsel %vm1761_vm3, %v4288_v1, -inf }
 0x24a   : > { %1790 = vmax.xlane.f32.xlu1 %v1789_v4  ;;  %v3269_v5 = vpop.f32.mrf.mxu0 }
 0x24c   : > { %v4292_v6 = vpop.f32.mrf.mxu0 }
 0x24d   : > { %v1798_v7 = vsel %vm1761_vm3, %v4292_v6, -inf }
 0x24e   : > { %1799 = vmax.xlane.f32.xlu0 %v1798_v7  ;;  %v3280_v9 = vpop.f32.mrf.mxu0 }
 0x250   : > { %v4296_v10 = vpop.f32.mrf.mxu0 }
 0x251   : > { %v1801_v14 = vsel %vm1761_vm3, %v4296_v10, -inf }
 0x252   : > { %1805 = vmax.xlane.f32.xlu0 %v1804_v13  ;;  %1802 = vmax.xlane.f32.xlu1 %v1801_v14  ;;  %v3281_v17 = vpop.f32.mrf.mxu0 }
 0x256   : > { %1808 = vmax.xlane.f32.xlu1 %v1807_v20 }
 0x297   : > { %v1323_v2 = vpop.xlane.xlu0 %1322 }
 0x298   : > { %v1345_v23 = vsub.f32 %v4208_v19, %v1323_v2 }
 0x29a   : > { %v1353_v24 = vmul.f32 1.442695, %v1345_v23 }
 0x29c   : > { %3460 = vpow2.f32 %v1353_v24 }
 0x29f   : > { %v1326_v25 = vpop.xlane.xlu0 %1325 }
 0x2a0   : > { %v1346_v27 = vsub.f32 %v4214_v43, %v1326_v25 }
 0x2a2   : > { %v1355_v47 = vmul.f32 1.442695, %v1346_v27 }
 0x2a4   : > { %3462 = vpow2.f32 %v1355_v47 }
 0x2a7   : > { %v1329_v59 = vpop.xlane.xlu1 %1328 }
 0x2a8   : > { %v1347_v32 = vsub.f32 %v4220_v53, %v1329_v59 }
 0x2a9   : > { %v4307_v22 = vpop.eup %3460 }
 0x2aa   : > { %v1357_v16 = vmul.f32 1.442695, %v1347_v32  ;;  %v1369_v62 = vsel %vm1320_vm2, %v4307_v22, 0.0 }
 0x2ab   : > { %v1332_v34 = vpop.xlane.xlu1 %1331  ;;  %1370 = vadd.xlane.f32.xlu0 %v1369_v62 }
 0x2ac   : > { %3464 = vpow2.f32 %v1357_v16  ;;  %v1348_v19 = vsub.f32 %v4212_v40, %v1332_v34 }
 0x2ae   : > { %v1359_v36 = vmul.f32 1.442695, %v1348_v19 }
 0x2af   : > { %v1338_v39 = vpop.xlane.xlu1 %1337  ;;  %v1335_v8 = vpop.xlane.xlu0 %1334 }
 0x2b0   : > { %3466 = vpow2.f32 %v1359_v36  ;;  %v1350_v43 = vsub.f32 %v4218_v52, %v1338_v39  ;;  %v1349_v46 = vsub.f32 %v4228_v0, %v1335_v8 }
 0x2b1   : > { %v4314_v53 = vpop.eup %3462 }
 0x2b2   : > { %v1363_v49 = vmul.f32 1.442695, %v1350_v43  ;;  %v1361_v50 = vmul.f32 1.442695, %v1349_v46  ;;  %v1372_v51 = vsel %vm1320_vm2, %v4314_v53, 0.0 }
 0x2b3   : > { %v1344_v55 = vpop.xlane.xlu1 %1343  ;;  %1373 = vadd.xlane.f32.xlu1 %v1372_v51 }
 0x2b4   : > { %3468 = vpow2.f32 %v1363_v49  ;;  %v1352_v40 = vsub.f32 %v4226_v63, %v1344_v55 }
 0x2b5   : > { %3470 = vpow2.f32 %v1361_v50 }
 0x2b6   : > { %v1367_v57 = vmul.f32 1.442695, %v1352_v40 }
 0x2b7   : > { %v1341_v58 = vpop.xlane.xlu0 %1340 }
 0x2b8   : > { %3472 = vpow2.f32 %v1367_v57  ;;  %v1351_v52 = vsub.f32 %v4238_v15, %v1341_v58 }
 0x2b9   : > { %v4320_v60 = vpop.eup %3464  ;;  %v1773_v0 = vpop.xlane.xlu1 %1772 }
 0x2ba   : > { %v1365_v44 = vmul.f32 1.442695, %v1351_v52  ;;  %v1813_v3 = vsub.f32 %v4242_v18, %v1773_v0  ;;  %v1375_v4 = vsel %vm1320_vm2, %v4320_v60, 0.0 }
 0x2bb   : > { %v1770_v5 = vpop.xlane.xlu0 %1769  ;;  %1376 = vadd.xlane.f32.xlu0 %v1375_v4 }
 0x2bc   : > { %3474 = vpow2.f32 %v1365_v44  ;;  %v1832_v7 = vmul.f32 1.442695, %v1813_v3  ;;  %v1812_v63 = vsub.f32 %v4236_v12, %v1770_v5 }
 0x2bd   : > { %v4326_v9 = vpop.eup %3466 }
 0x2be   : > { %3476 = vpow2.f32 %v1832_v7  ;;  %v1830_v13 = vmul.f32 1.442695, %v1812_v63  ;;  %v1378_v15 = vsel %vm1320_vm2, %v4326_v9, 0.0 }
 0x2bf   : > { %v1764_v14 = vpop.xlane.xlu0 %1763  ;;  %1379 = vadd.xlane.f32.xlu1 %v1378_v15 }
 0x2c0   : > { %3478 = vpow2.f32 %v1830_v13  ;;  %v1810_v18 = vsub.f32 %v4250_v28, %v1764_v14 }
 0x2c1   : > { %v4331_v17 = vpop.eup %3468 }
 0x2c2   : > { %v4333_v20 = vpop.eup %3470  ;;  %v1826_v2 = vmul.f32 1.442695, %v1810_v18  ;;  %v1384_v12 = vsel %vm1320_vm2, %v4331_v17, 0.0 }
 0x2c3   : > { %v1782_v23 = vpop.xlane.xlu0 %1781  ;;  %v1767_v24 = vpop.xlane.xlu1 %1766  ;;  %v1381_v25 = vsel %vm1320_vm2, %v4333_v20, 0.0  ;;  %1385 = vadd.xlane.f32.xlu1 %v1384_v12 }
 0x2c4   : > { %3480 = vpow2.f32 %v1826_v2  ;;  %v1816_v27 = vsub.f32 %v4248_v26, %v1782_v23  ;;  %v1811_v47 = vsub.f32 %v4256_v11, %v1767_v24  ;;  %1382 = vadd.xlane.f32.xlu0 %v1381_v25 }
 0x2c5   : > { %v4341_v28 = vpop.eup %3472 }
 0x2c6   : > { %v1838_v59 = vmul.f32 1.442695, %v1816_v27  ;;  %v1828_v32 = vmul.f32 1.442695, %v1811_v47  ;;  %v1390_v16 = vsel %vm1320_vm2, %v4341_v28, 0.0 }
 0x2c7   : > { %v1785_v62 = vpop.xlane.xlu1 %1784  ;;  %v1776_v34 = vpop.xlane.xlu0 %1775  ;;  %1391 = vadd.xlane.f32.xlu1 %v1390_v16 }
 0x2c8   : > { %3482 = vpow2.f32 %v1838_v59  ;;  %v1817_v19 = vsub.f32 %v4254_v29, %v1785_v62  ;;  %v1814_v36 = vsub.f32 %v4264_v35, %v1776_v34 }
 0x2c9   : > { %v4347_v39 = vpop.eup %3474  ;;  %3484 = vpow2.f32 %v1828_v32 }
 0x2ca   : > { %v1840_v26 = vmul.f32 1.442695, %v1817_v19  ;;  %v1834_v11 = vmul.f32 1.442695, %v1814_v36  ;;  %v1387_v8 = vsel %vm1320_vm2, %v4347_v39, 0.0 }
 0x2cb   : > { %v4351_v43 = vpop.eup %3476  ;;  %v1794_v46 = vpop.xlane.xlu0 %1793  ;;  %1388 = vadd.xlane.f32.xlu0 %v1387_v8 }
 0x2cc   : > { %v1779_v49 = vpop.xlane.xlu1 %1778  ;;  %3486 = vpow2.f32 %v1840_v26  ;;  %v1820_v50 = vsub.f32 %v4262_v33, %v1794_v46  ;;  %v1867_v35 = vsel %vm1761_vm3, %v4351_v43, 0.0 }
 0x2cd   : > { %v1815_v29 = vsub.f32 %v4272_v48, %v1779_v49  ;;  %v4357_v51 = vpop.eup %3478  ;;  %3488 = vpow2.f32 %v1834_v11  ;;  %1868 = vadd.xlane.f32.xlu1 %v1867_v35 }
 0x2ce   : > { %v1846_v55 = vmul.f32 1.442695, %v1820_v50  ;;  %v1864_v57 = vsel %vm1761_vm3, %v4357_v51, 0.0 }
 0x2cf   : > { %v1836_v40 = vmul.f32 1.442695, %v1815_v29  ;;  %v1788_v52 = vpop.xlane.xlu0 %1787  ;;  %1865 = vadd.xlane.f32.xlu0 %v1864_v57 }
 0x2d0   : > { %v1797_v58 = vpop.xlane.xlu1 %1796  ;;  %3490 = vpow2.f32 %v1846_v55  ;;  %v1818_v48 = vsub.f32 %v4280_v56, %v1788_v52 }
 0x2d1   : > { %v1821_v33 = vsub.f32 %v4270_v45, %v1797_v58  ;;  %v4363_v0 = vpop.eup %3480  ;;  %3492 = vpow2.f32 %v1836_v40 }
 0x2d2   : > { %v1842_v3 = vmul.f32 1.442695, %v1818_v48  ;;  %v1858_v4 = vsel %vm1761_vm3, %v4363_v0, 0.0 }
 0x2d3   : > { %v1848_v44 = vmul.f32 1.442695, %v1821_v33  ;;  %1859 = vadd.xlane.f32.xlu0 %v1858_v4 }
 0x2d4   : > { %v1791_v5 = vpop.xlane.xlu1 %1790 }
 0x2d5   : > { %3494 = vpow2.f32 %v1848_v44  ;;  %v1819_v7 = vsub.f32 %v4288_v1, %v1791_v5  ;;  %v4368_v63 = vpop.eup %3482 }
 0x2d6   : > { %3496 = vpow2.f32 %v1842_v3  ;;  %v4370_v13 = vpop.eup %3484  ;;  %v1876_v56 = vsel %vm1761_vm3, %v4368_v63, 0.0 }
 0x2d7   : > { %v1844_v45 = vmul.f32 1.442695, %v1819_v7  ;;  %1877 = vadd.xlane.f32.xlu0 %v1876_v56  ;;  %v1800_v15 = vpop.xlane.xlu0 %1799  ;;  %v1861_v14 = vsel %vm1761_vm3, %v4370_v13, 0.0 }
 0x2d8   : > { %v1822_v18 = vsub.f32 %v4292_v6, %v1800_v15  ;;  %1862 = vadd.xlane.f32.xlu1 %v1861_v14 }
 0x2d9   : > { %3498 = vpow2.f32 %v1844_v45  ;;  %v4377_v2 = vpop.eup %3486 }
 0x2da   : > { %v4379_v1 = vpop.eup %3488  ;;  %v1850_v12 = vmul.f32 1.442695, %v1822_v18  ;;  %v1879_v23 = vsel %vm1761_vm3, %v4377_v2, 0.0 }
 0x2db   : > { %v1870_v24 = vsel %vm1761_vm3, %v4379_v1, 0.0  ;;  %v1806_v25 = vpop.xlane.xlu0 %1805  ;;  %v1803_v27 = vpop.xlane.xlu1 %1802 }
 0x2dc   : > { %3500 = vpow2.f32 %v1850_v12  ;;  %1871 = vadd.xlane.f32.xlu0 %v1870_v24  ;;  %v1824_v47 = vsub.f32 %v4278_v54, %v1806_v25  ;;  %1880 = vadd.xlane.f32.xlu1 %v1879_v23  ;;  %v1823_v6 = vsub.f32 %v4296_v10, %v1803_v27 }
 0x2dd   : > { %v4387_v59 = vpop.eup %3490 }
 0x2de   : > { %v4389_v32 = vpop.eup %3492  ;;  %v1854_v16 = vmul.f32 1.442695, %v1824_v47  ;;  %v1852_v62 = vmul.f32 1.442695, %v1823_v6  ;;  %v1888_v34 = vsel %vm1761_vm3, %v4387_v59, 0.0 }
 0x2df   : > { %v1873_v19 = vsel %vm1761_vm3, %v4389_v32, 0.0  ;;  %v1809_v36 = vpop.xlane.xlu1 %1808 }
 0x2e0   : > { %3502 = vpow2.f32 %v1854_v16  ;;  %1889 = vadd.xlane.f32.xlu0 %v1888_v34  ;;  %1874 = vadd.xlane.f32.xlu1 %v1873_v19  ;;  %v1825_v54 = vsub.f32 %v4286_v61, %v1809_v36 }
 0x2e1   : > { %3504 = vpow2.f32 %v1852_v62 }
 0x2e2   : > { %v4396_v26 = vpop.eup %3494  ;;  %v1856_v11 = vmul.f32 1.442695, %v1825_v54  ;;  %v3556_v54 = vld [vmem:[%s3966_s28] sm:$0xff] }
 0x2e3   : > { %v4398_v10 = vpop.eup %3496  ;;  %v1891_v8 = vsel %vm1761_vm3, %v4396_v26, 0.0 }
 0x2e4   : > { %v1882_v46 = vsel %vm1761_vm3, %v4398_v10, 0.0  ;;  %3506 = vpow2.f32 %v1856_v11  ;;  %1892 = vadd.xlane.f32.xlu1 %v1891_v8 }
 0x2e5   : > { %1883 = vadd.xlane.f32.xlu0 %v1882_v46 }
 0x2e6   : > { %v4404_v49 = vpop.eup %3498 }
 0x2e7   : > { %v1885_v61 = vsel %vm1761_vm3, %v4404_v49, 0.0 }
 0x2e8   : > { %1886 = vadd.xlane.f32.xlu1 %v1885_v61 }
 0x2e9   : > { %v4408_v50 = vpop.eup %3500 }
 0x2ea   : > { %v1894_v29 = vsel %vm1761_vm3, %v4408_v50, 0.0 }
 0x2eb   : > { %1895 = vadd.xlane.f32.xlu0 %v1894_v29 }
 0x2ed   : > { %v4412_v35 = vpop.eup %3502 }
 0x2ee   : > { %v4414_v55 = vpop.eup %3504  ;;  %v1900_v40 = vsel %vm1761_vm3, %v4412_v35, 0.0 }
 0x2ef   : > { %1901 = vadd.xlane.f32.xlu0 %v1900_v40  ;;  %v1897_v57 = vsel %vm1761_vm3, %v4414_v55, 0.0 }
 0x2f0   : > { %1898 = vadd.xlane.f32.xlu1 %v1897_v57 }
 0x2f1   : > { %v4420_v58 = vpop.eup %3506 }
 0x2f2   : > { %v1903_v52 = vsel %vm1761_vm3, %v4420_v58, 0.0 }
 0x2f4   : > { %1904 = vadd.xlane.f32.xlu1 %v1903_v52 }
 0x334   : > { %v1371_v33 = vpop.xlane.xlu0 %1370 }
 0x335   : > { %3508 = vrcp.f32 %v1371_v33 }
 0x33c   : > { %v1374_v48 = vpop.xlane.xlu1 %1373 }
 0x33d   : > { %3510 = vrcp.f32 %v1374_v48 }
 0x342   : > { %v3509_v44 = vpop.eup %3508 }
 0x343   : > { %v1401_v3 = vmul.f32 %v3509_v44, %v4307_v22 }
 0x344   : > { %v1377_v4 = vpop.xlane.xlu0 %1376 }
 0x345   : > { %3512 = vrcp.f32 %v1377_v4  ;;  %v1409_v5 = vpack.c.bf16 %v1401_v3, %v1401_v3 }
 0x347   : > { %3291 = vmatmul.mubr.msk.bf16.vlgmr.msra.gmra.mxu0 %vm1320_vm2, %v1409_v5 }
 0x348   : > { %v1380_v7 = vpop.xlane.xlu1 %1379  ;;  %3301 = vmatpush3.bf16.msra.mxu0 %v4003_v21  ;;  %3302 = vmatprep.mubr.msk.bf16.mxu0 %vm3756_vm1, %v3755_v42 }
 0x349   : > { %3514 = vrcp.f32 %v1380_v7  ;;  %3312 = vmatprep.subr.bf16.mxu0 %v3755_v42  ;;  %v3558_v7 = vld [vmem:[%s3966_s28 + $0x18] sm:$0xff] }
 0x34a   : > { %v3511_v45 = vpop.eup %3510 }
 0x34b   : > { %v1402_v56 = vmul.f32 %v3511_v45, %v4314_v53  ;;  %v346_v45 = vpack.c.bf16 %v3558_v7, %v3558_v7 }
 0x34c   : > { %v1386_v15 = vpop.xlane.xlu1 %1385 }
 0x34d   : > { %v1383_v14 = vpop.xlane.xlu0 %1382  ;;  %3516 = vrcp.f32 %v1386_v15  ;;  %v1410_v22 = vpack.c.bf16 %v1402_v56, %v1402_v56  ;;  %v3559_v56 = vld [vmem:[%s3966_s28 + $0x10] sm:$0xff] }
 0x34e   : > { %3518 = vrcp.f32 %v1383_v14  ;;  %v345_v15 = vpack.c.bf16 %v3559_v56, %v3559_v56 }
 0x34f   : > { %3297 = vmatmul.mubr.msk.bf16.vlgmr.msra.gmra.mxu1 %vm1320_vm2, %v1410_v22 }
 0x350   : > { %3307 = vmatpush3.bf16.msra.mxu1 %v4017_v30  ;;  %3308 = vmatprep.mubr.msk.bf16.mxu1 %vm3756_vm1, %v3755_v42  ;;  %v1392_v21 = vpop.xlane.xlu1 %1391 }
 0x351   : > { %3318 = vmatprep.subr.bf16.mxu1 %v3755_v42  ;;  %3520 = vrcp.f32 %v1392_v21 }
 0x352   : > { %v3513_v18 = vpop.eup %3512 }
 0x353   : > { %v1403_v12 = vmul.f32 %v3513_v18, %v4320_v60 }
 0x354   : > { %v1389_v53 = vpop.xlane.xlu0 %1388 }
 0x355   : > { %3522 = vrcp.f32 %v1389_v53  ;;  %v1411_v23 = vpack.c.bf16 %v1403_v12, %v1403_v12 }
 0x356   : > { %v3515_v24 = vpop.eup %3514  ;;  %v1869_v6 = vpop.xlane.xlu1 %1868 }
 0x357   : > { %3303 = vmatmul.mubr.msk.bf16.vlgmr.msra.gmra.mxu0 %vm1320_vm2, %v1411_v23  ;;  %v1404_v25 = vmul.f32 %v3515_v24, %v4326_v9  ;;  %v2045_v24 = vsel %vm1949_vm4, %v345_v15, 0 }
 0x358   : > { %v1866_v27 = vpop.xlane.xlu0 %1865  ;;  %3313 = vmatpush3.bf16.msra.mxu0 %v4019_v31  ;;  %3314 = vmatprep.mubr.msk.bf16.mxu0 %vm3756_vm1, %v3755_v42 }
 0x359   : > { %v1412_v30 = vpack.c.bf16 %v1404_v25, %v1404_v25  ;;  %3324 = vmatprep.subr.bf16.mxu0 %v3755_v42  ;;  %3524 = vrcp.f32 %v1866_v27 }
 0x35a   : > { %v3517_v47 = vpop.eup %3516  ;;  %3526 = vrcp.f32 %v1869_v6  ;;  %v3561_v6 = vld [vmem:[%s3966_s28 + $0x20] sm:$0xff] }
 0x35b   : > { %v3519_v60 = vpop.eup %3518  ;;  %3309 = vmatmul.mubr.msk.bf16.vlgmr.msra.gmra.mxu1 %vm1320_vm2, %v1412_v30  ;;  %v1406_v31 = vmul.f32 %v3517_v47, %v4331_v17  ;;  %v343_v17 = vpack.c.bf16 %v3556_v54, %v3556_v54 }
 0x35c   : > { %v1860_v16 = vpop.xlane.xlu0 %1859  ;;  %v1405_v62 = vmul.f32 %v3519_v60, %v4333_v20  ;;  %3319 = vmatpush3.bf16.msra.mxu1 %v4030_v37  ;;  %3320 = vmatprep.mubr.msk.bf16.mxu1 %vm3756_vm1, %v3755_v42 }
 0x35d   : > { %3330 = vmatprep.subr.bf16.mxu1 %v3755_v42  ;;  %3528 = vrcp.f32 %v1860_v16  ;;  %v1414_v36 = vpack.c.bf16 %v1406_v31, %v1406_v31  ;;  %v1951_v57 = vsel %vm1949_vm4, %v343_v17, 0  ;;  %v347_v16 = vpack.c.bf16 %v3561_v6, %v3561_v6 }
 0x35e   : > { %v1413_v9 = vpack.c.bf16 %v1405_v62, %v1405_v62  ;;  %v3521_v19 = vpop.eup %3520 }
 0x35f   : > { %v1408_v40 = vmul.f32 %v3521_v19, %v4341_v28 }
 0x360   : > { %3315 = vmatmul.mubr.msk.bf16.vlgmr.msra.gmra.mxu0 %vm1320_vm2, %v1413_v9  ;;  %v1878_v34 = vpop.xlane.xlu0 %1877 }
 0x361   : > { %v1863_v20 = vpop.xlane.xlu1 %1862  ;;  %3325 = vmatpush3.bf16.msra.mxu0 %v4032_v38  ;;  %3326 = vmatprep.mubr.msk.bf16.mxu0 %vm3756_vm1, %v3755_v42  ;;  %v3557_v38 = vld [vmem:[%s3966_s28 + $0x8] sm:$0xff]  ;;  %v1416_v52 = vpack.c.bf16 %v1408_v40, %v1408_v40 }
 0x362   : > { %v3523_v37 = vpop.eup %3522  ;;  %3530 = vrcp.f32 %v1863_v20  ;;  %3336 = vmatprep.subr.bf16.mxu0 %v3755_v42  ;;  %v344_v8 = vpack.c.bf16 %v3557_v38, %v3557_v38 }
 0x363   : > { %3321 = vmatmul.mubr.msk.bf16.vlgmr.msra.gmra.mxu1 %vm1320_vm2, %v1414_v36  ;;  %v1407_v11 = vmul.f32 %v3523_v37, %v4347_v39  ;;  %3532 = vrcp.f32 %v1878_v34 }
 0x364   : > { %3331 = vmatpush3.bf16.msra.mxu1 %v4040_v41  ;;  %3332 = vmatprep.mubr.msk.bf16.mxu1 %vm3756_vm1, %v3755_v42  ;;  %v1998_v33 = vsel %vm1949_vm4, %v344_v8, 0 }
 0x365   : > { %v1872_v46 = vpop.xlane.xlu0 %1871  ;;  %v1881_v61 = vpop.xlane.xlu1 %1880  ;;  %v1415_v29 = vpack.c.bf16 %v1407_v11, %v1407_v11  ;;  %3342 = vmatprep.subr.bf16.mxu1 %v3755_v42  ;;  %v3562_v11 = vld [vmem:[%s3966_s28 + $0x38] sm:$0xff] }
 0x366   : > { %3534 = vrcp.f32 %v1881_v61  ;;  %v3525_v28 = vpop.eup %3524  ;;  %v350_v38 = vpack.c.bf16 %v3562_v11, %v3562_v11  ;;  %v3563_v61 = vld [vmem:[%s3966_s28 + $0x30] sm:$0xff] }
 0x367   : > { %3536 = vrcp.f32 %v1872_v46  ;;  %v3527_v48 = vpop.eup %3526  ;;  %v1924_v5 = vmul.f32 %v3525_v28, %v4357_v51  ;;  %v2092_v51 = vsel %vm1949_vm4, %v346_v45, 0 }
 0x368   : > { %3327 = vmatmul.mubr.msk.bf16.vlgmr.msra.gmra.mxu0 %vm1320_vm2, %v1415_v29  ;;  %v1925_v22 = vmul.f32 %v3527_v48, %v4351_v43  ;;  %v349_v29 = vpack.c.bf16 %v3563_v61, %v3563_v61 }
 0x369   : > { %v1890_v41 = vpop.xlane.xlu0 %1889  ;;  %v1875_v39 = vpop.xlane.xlu1 %1874  ;;  %3337 = vmatpush3.bf16.msra.mxu0 %v1951_v57  ;;  %3338 = vmatprep.mubr.msk.bf16.mxu0 %vm3756_vm1, %v3755_v42 }
 0x36a   : > { %3348 = vmatprep.subr.bf16.mxu0 %v3755_v42  ;;  %3538 = vrcp.f32 %v1875_v39  ;;  %v3529_v44 = vpop.eup %3528  ;;  %v1939_v53 = vpack.c.bf16 %v1925_v22, %v1924_v5 }
 0x36b   : > { %3333 = vmatmul.mubr.msk.bf16.vlgmr.msra.gmra.mxu1 %vm1320_vm2, %v1416_v52  ;;  %3540 = vrcp.f32 %v1890_v41  ;;  %v1922_v21 = vmul.f32 %v3529_v44, %v4363_v0  ;;  %v2280_v41 = vsel %vm1949_vm4, %v350_v38, 0  ;;  %v2233_v52 = vsel %vm1949_vm4, %v349_v29, 0 }
 0x36c   : > { %3343 = vmatpush3.bf16.msra.mxu1 %v1998_v33  ;;  %3344 = vmatprep.mubr.msk.bf16.mxu1 %vm3756_vm1, %v3755_v42 }
 0x36d   : > { %v1893_v4 = vpop.xlane.xlu1 %1892  ;;  %3354 = vmatprep.subr.bf16.mxu1 %v3755_v42 }
 0x36e   : > { %v1884_v3 = vpop.xlane.xlu0 %1883  ;;  %3542 = vrcp.f32 %v1893_v4 }
 0x36f   : > { %v3531_v14 = vpop.eup %3530  ;;  %3544 = vrcp.f32 %v1884_v3 }
 0x370   : > { %v1923_v18 = vmul.f32 %v3531_v14, %v4370_v13  ;;  %v3533_v25 = vpop.eup %3532  ;;  %v3560_v13 = vld [vmem:[%s3966_s28 + $0x28] sm:$0xff]  ;;  %s3646_s28 = scalar_lea.vmem %s4682_s0, 256 }
 0x371   : > { %v1887_v12 = vpop.xlane.xlu1 %1886  ;;  %v348_v30 = vpack.c.bf16 %v3560_v13, %v3560_v13  ;;  %v1928_v60 = vmul.f32 %v3533_v25, %v4368_v63  ;;  %v2139_v63 = vsel %vm1949_vm4, %v347_v16, 0  ;;  %p3647_p6 = scmp.ne.s32.totalorder %s4682_s0, %s3646_s28  ;;  %p3654_p5 = scmp.lt.s32.totalorder %s3652_s9, %s3646_s28 }
 0x372   : > { %3546 = vrcp.f32 %v1887_v12  ;;  %v1938_v23 = vpack.c.bf16 %v1923_v18, %v1922_v21 }
 0x373   : > { %3345 = vmatmul.mubr.msk.bf16.vlgmr.msra.gmra.mxu1 %vm1761_vm3, %v1939_v53  ;;  %v3535_v27 = vpop.eup %3534  ;;  %v2186_v20 = vsel %vm1949_vm4, %v348_v30, 0  ;;  %p3648_p12 = pnand %p3647_p6, %p4798_p9  ;;  %p3655_p2 = por %p3654_p5, %p3653_p0 }
 0x374   : > { %3339 = vmatmul.mubr.msk.bf16.vlgmr.msra.gmra.mxu0 %vm1761_vm3, %v1938_v23  ;;  %v1896_v43 = vpop.xlane.xlu0 %1895  ;;  %3355 = vmatpush3.bf16.msra.mxu1 %v2092_v51  ;;  %v1929_v0 = vmul.f32 %v3535_v27, %v4377_v2  ;;  %v3537_v47 = vpop.eup %3536  ;;  %v2328_v23 = vlaneseq }
 0x375   : > { %3349 = vmatpush3.bf16.msra.mxu0 %v2045_v24  ;;  %3350 = vmatprep.mubr.msk.bf16.mxu0 %vm3756_vm1, %v3755_v42  ;;  %3548 = vrcp.f32 %v1896_v43  ;;  %v1926_v2 = vmul.f32 %v3537_v47, %v4379_v1  ;;  %p3649_p13 = pneg %p3648_p12 }
 0x376   : > { %3356 = vmatprep.mubr.msk.bf16.mxu1 %vm3756_vm1, %v3755_v42  ;;  %3360 = vmatprep.subr.bf16.mxu0 %v3755_v42  ;;  %v1941_v19 = vpack.c.bf16 %v1929_v0, %v1928_v60  ;;  %v2329_v13 = vshrl.u32 %v2328_v23, 7 }
 0x377   : > { %3366 = vmatprep.subr.bf16.mxu1 %v3755_v42  ;;  %v3539_v62 = vpop.eup %3538  ;;  %p3656_p10 = pnand %p3655_p2, %p3649_p13 }
 0x378   : > { %v1902_v31 = vpop.xlane.xlu0 %1901  ;;  %v1927_v34 = vmul.f32 %v3539_v62, %v4389_v32  ;;  %v3541_v36 = vpop.eup %3540  ;;  %v3758_v62 = vmov 1934713408  }
 0x379   : > { %v1899_v9 = vpop.xlane.xlu1 %1898  ;;  %v1932_v46 = vmul.f32 %v3541_v36, %v4387_v59 }
 0x37a   : > { %3550 = vrcp.f32 %v1899_v9  ;;  %v1940_v37 = vpack.c.bf16 %v1927_v34, %v1926_v2 }
 0x37b   : > { %3357 = vmatmul.mubr.msk.bf16.vlgmr.msra.gmra.mxu1 %vm1761_vm3, %v1941_v19  ;;  %v3543_v54 = vpop.eup %3542  ;;  %3552 = vrcp.f32 %v1902_v31  ;;  %v2390_v31 = vunpack.c.l.s4 %v3758_v62 }
 0x37c   : > { %3367 = vmatpush3.bf16.msra.mxu1 %v2186_v20  ;;  %3368 = vmatprep.mubr.msk.bf16.mxu1 %vm3756_vm1, %v3755_v42  ;;  %v3545_v1 = vpop.eup %3544  ;;  %v1933_v17 = vmul.f32 %v3543_v54, %v4396_v26 }
 0x37d   : > { %3351 = vmatmul.mubr.msk.bf16.vlgmr.msra.gmra.mxu0 %vm1761_vm3, %v1940_v37  ;;  %v1905_v32 = vpop.xlane.xlu1 %1904  ;;  %3378 = vmatprep.subr.bf16.mxu1 %v3755_v42  ;;  %v1930_v40 = vmul.f32 %v3545_v1, %v4398_v10  ;;  %v2391_v1 = vunpack.c.0.s8 %v2390_v31 }
 0x37e   : > { %3554 = vrcp.f32 %v1905_v32  ;;  %3361 = vmatpush3.bf16.msra.mxu0 %v2139_v63  ;;  %3362 = vmatprep.mubr.msk.bf16.mxu0 %vm3756_vm1, %v3755_v42  ;;  %v1943_v57 = vpack.c.bf16 %v1933_v17, %v1932_v46 }
 0x37f   : > { %v3547_v8 = vpop.eup %3546  ;;  %3372 = vmatprep.subr.bf16.mxu0 %v3755_v42 }
 0x380   : > { %v1931_v26 = vmul.f32 %v3547_v8, %v4404_v49 }
 0x382   : > { %v1942_v39 = vpack.c.bf16 %v1931_v26, %v1930_v40  ;;  %v3549_v59 = vpop.eup %3548 }
 0x383   : > { %3369 = vmatmul.mubr.msk.bf16.vlgmr.msra.gmra.mxu1 %vm1761_vm3, %v1943_v57  ;;  %v1934_v49 = vmul.f32 %v3549_v59, %v4408_v50 }
 0x384   : > { %3379 = vmatpush3.bf16.msra.mxu1 %v2280_v41  ;;  %3380 = vmatprep.mubr.msk.bf16.mxu1 %vm3756_vm1, %v3755_v42 }
 0x385   : > { %3363 = vmatmul.mubr.msk.bf16.vlgmr.msra.gmra.mxu0 %vm1761_vm3, %v1942_v39  ;;  %v4532_v39 = vsub.s32 %v2391_v1, %v2329_v13 }
 0x386   : > { %3373 = vmatpush3.bf16.msra.mxu0 %v2233_v52  ;;  %3374 = vmatprep.mubr.msk.bf16.mxu0 %vm3756_vm1, %v3755_v42 }
 0x387   : > { %v3551_v10 = vpop.eup %3550 }
 0x388   : > { %v1935_v33 = vmul.f32 %v3551_v10, %v4414_v55  ;;  %v3553_v28 = vpop.eup %3552 }
 0x389   : > { %v1936_v3 = vmul.f32 %v3553_v28, %v4412_v35 }
 0x38a   : > { %v1944_v48 = vpack.c.bf16 %v1935_v33, %v1934_v49 }
 0x38b   : > { %v3555_v44 = vpop.eup %3554 }
 0x38c   : > { %v1937_v4 = vmul.f32 %v3555_v44, %v4420_v58  ;;  %v3757_v58 = vmov 1983009808  }
 0x38d   : > { %3375 = vmatmul.mubr.msk.bf16.vlgmr.msra.gmra.mxu0 %vm1761_vm3, %v1944_v48  ;;  %v2326_v51 = vunpack.c.l.s4 %v3757_v58 }
 0x38e   : > { %v1945_v5 = vpack.c.bf16 %v1937_v4, %v1936_v3 }
 0x38f   : > { %v2327_v0 = vunpack.c.0.s8 %v2326_v51 }
 0x390   : > { %3381 = vmatmul.mubr.msk.bf16.vlgmr.msra.gmra.mxu1 %vm1761_vm3, %v1945_v5 }
 0x391   : > { %v4526_v19 = vsub.s32 %v2327_v0, %v2329_v13 }
 0x407   : > { %v1454_v7 = vpop.f32.mrf.mxu0 }
 0x409   : > { %v3292_v45 = vpop.f32.mrf.mxu0 }
 0x40b   : > { %v1457_v42 = vpop.f32.mrf.mxu0 }
 0x40d   : > { %v3293_v56 = vpop.f32.mrf.mxu0 }
 0x40f   : > { %v1497_v15 = vpop.f32.mrf.mxu1 }
 0x411   : > { %v3298_v50 = vpop.f32.mrf.mxu1 }
 0x413   : > { %v1500_v14 = vpop.f32.mrf.mxu1 }
 0x415   : > { %v3299_v55 = vpop.f32.mrf.mxu1 }
 0x417   : > { %v1540_v22 = vpop.f32.mrf.mxu0 }
 0x418   : > { %v2323_v2 = vcombine.low %v1454_v7, %v1540_v22  ;;  %v2324_v34 = vcombine.high %v1454_v7, %v1540_v22 }
 0x419   : > { %v3304_v21 = vpop.f32.mrf.mxu0 }
 0x41a   : > { %v2331_v38 = vrot.slane %v2323_v2, %v4526_v19  ;;  %v2338_v8 = vrot.slane %v2324_v34, %v4526_v19 }
 0x41b   : > { %v1543_v18 = vpop.f32.mrf.mxu0  ;;  %v1583_v12 = vpop.f32.mrf.mxu1 }
 0x41c   : > { %v2339_v60 = vcombine.low %v1497_v15, %v1583_v12  ;;  %v2340_v6 = vcombine.high %v1497_v15, %v1583_v12 }
 0x41d   : > { %v3305_v35 = vpop.f32.mrf.mxu0  ;;  %v3310_v53 = vpop.f32.mrf.mxu1 }
 0x41e   : > { %v2347_v37 = vrot.slane %v2339_v60, %v4526_v19  ;;  %v2354_v63 = vrot.slane %v2340_v6, %v4526_v19 }
 0x41f   : > { %v1586_v24 = vpop.f32.mrf.mxu1 }
 0x420   : > { %v1626_v25 = vpop.f32.mrf.mxu0  ;;  %v2387_v26 = vcombine.low %v2331_v38, %v2347_v37  ;;  %v2403_v57 = vcombine.low %v2338_v8, %v2354_v63  ;;  %v2388_v5 = vcombine.high %v2331_v38, %v2347_v37  ;;  %v2404_v7 = vcombine.high %v2338_v8, %v2354_v63 }
 0x421   : > { %v3311_v27 = vpop.f32.mrf.mxu1 }
 0x422   : > { %v3316_v43 = vpop.f32.mrf.mxu0  ;;  %v4539_v42 = vrot.slane %v2403_v57, %v4532_v39  ;;  %v4545_v15 = vrot.slane %v2387_v26, %v4532_v39  ;;  %v2418_v23 = vrot.slane %v2404_v7, %v4532_v39  ;;  %v2402_v24 = vrot.slane %v2388_v5, %v4532_v39 }
 0x423   : > { %v1669_v30 = vpop.f32.mrf.mxu1 }
 0x424   : > { %v1629_v47 = vpop.f32.mrf.mxu0 }
 0x425   : > { %v3322_v16 = vpop.f32.mrf.mxu1 }
 0x426   : > { %v3317_v9 = vpop.f32.mrf.mxu0 }
 0x427   : > { %v1672_v20 = vpop.f32.mrf.mxu1 }
 0x428   : > { %v1712_v36 = vpop.f32.mrf.mxu0 }
 0x429   : > { %v3323_v54 = vpop.f32.mrf.mxu1  ;;  %v2355_v32 = vcombine.low %v1626_v25, %v1712_v36  ;;  %v2356_v17 = vcombine.high %v1626_v25, %v1712_v36 }
 0x42a   : > { %v3328_v11 = vpop.f32.mrf.mxu0 }
 0x42b   : > { %v1755_v46 = vpop.f32.mrf.mxu1  ;;  %v2363_v52 = vrot.slane %v2355_v32, %v4526_v19  ;;  %v2370_v59 = vrot.slane %v2356_v17, %v4526_v19 }
 0x42c   : > { %v1715_v61 = vpop.f32.mrf.mxu0  ;;  %v2371_v29 = vcombine.low %v1669_v30, %v1755_v46  ;;  %v2372_v40 = vcombine.high %v1669_v30, %v1755_v46 }
 0x42d   : > { %v3334_v41 = vpop.f32.mrf.mxu1 }
 0x42e   : > { %v2379_v10 = vrot.slane %v2371_v29, %v4526_v19  ;;  %v2386_v49 = vrot.slane %v2372_v40, %v4526_v19  ;;  %v3329_v33 = vpop.f32.mrf.mxu0 }
 0x42f   : > { %v1758_v28 = vpop.f32.mrf.mxu1 }
 0x430   : > { %v2419_v48 = vcombine.low %v2363_v52, %v2379_v10  ;;  %v2420_v44 = vcombine.high %v2363_v52, %v2379_v10  ;;  %v2435_v3 = vcombine.low %v2370_v59, %v2386_v49  ;;  %v2436_v4 = vcombine.high %v2370_v59, %v2386_v49 }
 0x431   : > { %v3335_v45 = vpop.f32.mrf.mxu1 }
 0x432   : > { %v4542_v56 = vrot.slane %v2435_v3, %v4532_v39  ;;  %v4548_v50 = vrot.slane %v2419_v48, %v4532_v39  ;;  %v2450_v18 = vrot.slane %v2436_v4, %v4532_v39  ;;  %v2434_v12 = vrot.slane %v2420_v44, %v4532_v39 }
 0x433   : > { %v2034_v14 = vpop.f32.mrf.mxu1 }
 0x434   : > { %v1987_v55 = vpop.f32.mrf.mxu0  ;;  %v2456_v22 = vcombine.high %v4539_v42, %v4542_v56  ;;  %v2452_v21 = vcombine.high %v4545_v15, %v4548_v50  ;;  %v2455_v53 = vcombine.low %v4539_v42, %v4542_v56  ;;  %v2451_v58 = vcombine.low %v4545_v15, %v4548_v50 }
 0x435   : > { %v3346_v35 = vpop.f32.mrf.mxu1  ;;  %v2457_v43 = vcombine.low %v2418_v23, %v2450_v18  ;;  %v2453_v0 = vcombine.low %v2402_v24, %v2434_v12  ;;  %v2458_v60 = vcombine.high %v2418_v23, %v2450_v18  ;;  %v2454_v62 = vcombine.high %v2402_v24, %v2434_v12 }
 0x436   : > { %v3340_v51 = vpop.f32.mrf.mxu0  ;;  %2472 = vrot.lane.b32.xlu1 %v2456_v22, %s3759_s29  ;;  %2460 = vrot.lane.b32.xlu0 %v2452_v21, %s3759_s29 }
 0x437   : > { %v4564_v25 = vpop.f32.mrf.mxu1 }
 0x438   : > { %v4566_v27 = vpop.f32.mrf.mxu0 }
 0x439   : > { %v3347_v13 = vpop.f32.mrf.mxu1 }
 0x43a   : > { %v3341_v30 = vpop.f32.mrf.mxu0  ;;  %2476 = vrot.lane.b32.xlu1 %v2457_v43, %s3760_s17  ;;  %2464 = vrot.lane.b32.xlu0 %v2453_v0, %s3760_s17 }
 0x43b   : > { %v2128_v47 = vpop.f32.mrf.mxu1 }
 0x43c   : > { %v2509_v17 = vcombine.low %v2034_v14, %v2128_v47  ;;  %v2510_v61 = vcombine.high %v2034_v14, %v2128_v47 }
 0x43d   : > { %v2081_v6 = vpop.f32.mrf.mxu0  ;;  %v3358_v16 = vpop.f32.mrf.mxu1 }
 0x43e   : > { %2480 = vrot.lane.b32.xlu1 %v2458_v60, %s3761_s6  ;;  %2468 = vrot.lane.b32.xlu0 %v2454_v62, %s3761_s6  ;;  %v2493_v32 = vcombine.low %v1987_v55, %v2081_v6  ;;  %v2494_v46 = vcombine.high %v1987_v55, %v2081_v6  ;;  %v2517_v40 = vrot.slane %v2509_v17, %v4526_v19 }
 0x43f   : > { %v3352_v31 = vpop.f32.mrf.mxu0  ;;  %v2131_v9 = vpop.f32.mrf.mxu1  ;;  %v4580_v33 = vrot.slane %v2510_v61, %v4526_v19 }
 0x440   : > { %v2501_v29 = vrot.slane %v2493_v32, %v4526_v19  ;;  %v2645_v41 = vcombine.low %v4564_v25, %v2131_v9  ;;  %v4577_v49 = vrot.slane %v2494_v46, %v4526_v19  ;;  %v2646_v28 = vcombine.high %v4564_v25, %v2131_v9 }
 0x441   : > { %v2084_v2 = vpop.f32.mrf.mxu0  ;;  %v3359_v34 = vpop.f32.mrf.mxu1 }
 0x442   : > { %v2629_v57 = vcombine.low %v4566_v27, %v2084_v2  ;;  %v2557_v44 = vcombine.low %v2501_v29, %v2517_v40  ;;  %v2558_v3 = vcombine.high %v2501_v29, %v2517_v40  ;;  %v2630_v45 = vcombine.high %v4566_v27, %v2084_v2 }
 0x443   : > { %v3353_v20 = vpop.f32.mrf.mxu0  ;;  %v2222_v36 = vpop.f32.mrf.mxu1  ;;  %v2653_v55 = vrot.slane %v2645_v41, %v4526_v19  ;;  %v2573_v24 = vcombine.low %v4577_v49, %v4580_v33  ;;  %v4593_v25 = vrot.slane %v2646_v28, %v4526_v19  ;;  %v2574_v46 = vcombine.high %v4577_v49, %v4580_v33 }
 0x444   : > { %v2637_v14 = vrot.slane %v2629_v57, %v4526_v19  ;;  %v2572_v47 = vrot.slane %v2558_v3, %v4532_v39  ;;  %v2644_v60 = vrot.slane %v2630_v45, %v4526_v19  ;;  %v4598_v31 = vrot.slane %v2557_v44, %v4532_v39 }
 0x445   : > { %v2175_v37 = vpop.f32.mrf.mxu0  ;;  %v3370_v63 = vpop.f32.mrf.mxu1  ;;  %v2588_v28 = vrot.slane %v2574_v46, %v4532_v39 }
 0x446   : > { %v2693_v9 = vcombine.low %v2637_v14, %v2653_v55  ;;  %v2694_v33 = vcombine.high %v2637_v14, %v2653_v55 }
 0x447   : > { %v3364_v54 = vpop.f32.mrf.mxu0  ;;  %v2225_v1 = vpop.f32.mrf.mxu1 }
 0x448   : > { %v4625_v40 = vrot.slane %v2693_v9, %v4532_v39 }
 0x449   : > { %v2178_v11 = vpop.f32.mrf.mxu0  ;;  %v3371_v38 = vpop.f32.mrf.mxu1 }
 0x44b   : > { %v3365_v8 = vpop.f32.mrf.mxu0 }
 0x44d   : > { %v2269_v26 = vpop.f32.mrf.mxu0 }
 0x44e   : > { %v2525_v52 = vcombine.low %v2175_v37, %v2269_v26  ;;  %v2526_v59 = vcombine.high %v2175_v37, %v2269_v26 }
 0x44f   : > { %v3376_v10 = vpop.f32.mrf.mxu0 }
 0x450   : > { %v2316_v48 = vpop.f32.mrf.mxu1  ;;  %v2533_v22 = vrot.slane %v2525_v52, %v4526_v19  ;;  %v2540_v18 = vrot.slane %v2526_v59, %v4526_v19 }
 0x451   : > { %v2272_v4 = vpop.f32.mrf.mxu0  ;;  %v2541_v5 = vcombine.low %v2222_v36, %v2316_v48  ;;  %v2542_v7 = vcombine.high %v2222_v36, %v2316_v48 }
 0x452   : > { %v3382_v21 = vpop.f32.mrf.mxu1  ;;  %v2661_v12 = vcombine.low %v2178_v11, %v2272_v4  ;;  %v2662_v27 = vcombine.high %v2178_v11, %v2272_v4  ;;  %v2709_v11 = vcombine.low %v2644_v60, %v4593_v25 }
 0x453   : > { %v2549_v35 = vrot.slane %v2541_v5, %v4526_v19  ;;  %v2556_v51 = vrot.slane %v2542_v7, %v4526_v19  ;;  %v3377_v23 = vpop.f32.mrf.mxu0  ;;  %v2708_v7 = vrot.slane %v2694_v33, %v4532_v39 }
 0x454   : > { %v2319_v43 = vpop.f32.mrf.mxu1  ;;  %v2669_v2 = vrot.slane %v2661_v12, %v4526_v19  ;;  %v2676_v36 = vrot.slane %v2662_v27, %v4526_v19  ;;  %v4638_v49 = vrot.slane %v2709_v11, %v4532_v39 }
 0x455   : > { %v2589_v0 = vcombine.low %v2533_v22, %v2549_v35  ;;  %v2590_v13 = vcombine.high %v2533_v22, %v2549_v35  ;;  %v2605_v30 = vcombine.low %v2540_v18, %v2556_v51  ;;  %v2677_v6 = vcombine.low %v2225_v1, %v2319_v43 }
 0x456   : > { %v2678_v16 = vcombine.high %v2225_v1, %v2319_v43  ;;  %v3383_v62 = vpop.f32.mrf.mxu1  ;;  %v2606_v37 = vcombine.high %v2540_v18, %v2556_v51  ;;  %v2710_v22 = vcombine.high %v2644_v60, %v4593_v25 }
 0x457   : > { %v2604_v34 = vrot.slane %v2590_v13, %v4532_v39  ;;  %v4603_v20 = vrot.slane %v2589_v0, %v4532_v39  ;;  %v2685_v63 = vrot.slane %v2677_v6, %v4526_v19  ;;  %v4611_v17 = vrot.slane %v2605_v30, %v4532_v39 }
 0x458   : > { %v2692_v54 = vrot.slane %v2678_v16, %v4526_v19  ;;  %v4619_v19 = vrot.slane %v2573_v24, %v4532_v39  ;;  %v2620_v29 = vrot.slane %v2606_v37, %v4532_v39  ;;  %v2724_v35 = vrot.slane %v2710_v22, %v4532_v39 }
 0x459   : > { %v2623_v1 = vcombine.low %v2572_v47, %v2604_v34  ;;  %v2622_v32 = vcombine.high %v4598_v31, %v4603_v20  ;;  %v2725_v38 = vcombine.low %v2669_v2, %v2685_v63  ;;  %v2621_v61 = vcombine.low %v4598_v31, %v4603_v20 }
 0x45a   : > { %v2741_v8 = vcombine.low %v2676_v36, %v2692_v54  ;;  %v2726_v41 = vcombine.high %v2669_v2, %v2685_v63  ;;  %v2624_v52 = vcombine.high %v2572_v47, %v2604_v34  ;;  %v2626_v59 = vcombine.high %v4619_v19, %v4611_v17 }
 0x45b   : > { %2770 = vrot.lane.b32.xlu0 %v2623_v1, %s3760_s17  ;;  %2766 = vrot.lane.b32.xlu1 %v2622_v32, %s3759_s29  ;;  %v4628_v26 = vrot.slane %v2725_v38, %v4532_v39  ;;  %v2625_v10 = vcombine.low %v4619_v19, %v4611_v17  ;;  %v2627_v3 = vcombine.low %v2588_v28, %v2620_v29 }
 0x45c   : > { %v4631_v57 = vrot.slane %v2741_v8, %v4532_v39  ;;  %v2740_v5 = vrot.slane %v2726_v41, %v4532_v39  ;;  %v2742_v45 = vcombine.high %v2676_v36, %v2692_v54  ;;  %v2628_v14 = vcombine.high %v2588_v28, %v2620_v29 }
 0x45d   : > { %v2757_v48 = vcombine.low %v4625_v40, %v4628_v26  ;;  %v2758_v4 = vcombine.high %v4625_v40, %v4628_v26 }
 0x45e   : > { %v2761_v44 = vcombine.low %v4638_v49, %v4631_v57  ;;  %v2759_v55 = vcombine.low %v2708_v7, %v2740_v5  ;;  %v2762_v21 = vcombine.high %v4638_v49, %v4631_v57  ;;  %v2760_v18 = vcombine.high %v2708_v7, %v2740_v5 }
 0x45f   : > { %2774 = vrot.lane.b32.xlu0 %v2624_v52, %s3761_s6  ;;  %2778 = vrot.lane.b32.xlu1 %v2626_v59, %s3759_s29  ;;  %v2756_v12 = vrot.slane %v2742_v45, %v4532_v39 }
 0x461   : > { %v2763_v51 = vcombine.low %v2724_v35, %v2756_v12  ;;  %v2764_v23 = vcombine.high %v2724_v35, %v2756_v12 }
 0x463   : > { %2782 = vrot.lane.b32.xlu1 %v2627_v3, %s3760_s17  ;;  %2790 = vrot.lane.b32.xlu0 %v2758_v4, %s3759_s29 }
 0x467   : > { %2786 = vrot.lane.b32.xlu1 %v2628_v14, %s3761_s6  ;;  %2794 = vrot.lane.b32.xlu0 %v2759_v55, %s3760_s17 }
 0x46b   : > { %2802 = vrot.lane.b32.xlu1 %v2762_v21, %s3759_s29  ;;  %2798 = vrot.lane.b32.xlu0 %v2760_v18, %s3761_s6 }
 0x46f   : > { %2806 = vrot.lane.b32.xlu1 %v2763_v51, %s3760_s17 }
 0x473   : > { %2810 = vrot.lane.b32.xlu1 %v2764_v23, %s3761_s6 }
 0x4a8   : > { %v2473_v24 = vpop.permute.xlu1 %2472  ;;  %v2461_v25 = vpop.permute.xlu0 %2460 }
 0x4a9   : > { %v2488_v39 = vsel %vm385_vm0, %v2455_v53, %v2473_v24  ;;  %v2483_v0 = vsel %vm385_vm0, %v2451_v58, %v2461_v25 }
 0x4ac   : > { %v2477_v27 = vpop.permute.xlu1 %2476  ;;  %v2465_v43 = vpop.permute.xlu0 %2464 }
 0x4ad   : > { %v2489_v13 = vsel %vm2484_vm5, %v2488_v39, %v2477_v27  ;;  %v2485_v47 = vsel %vm2484_vm5, %v2483_v0, %v2465_v43 }
 0x4b0   : > { %v2481_v30 = vpop.permute.xlu1 %2480  ;;  %v2469_v6 = vpop.permute.xlu0 %2468 }
 0x4b1   : > { %v2490_v60 = vsel %vm2486_vm6, %v2489_v13, %v2481_v30  ;;  %v2487_v42 = vsel %vm2486_vm6, %v2485_v47, %v2469_v6 }
 0x4b2   : > { %2492 = vst [vmem:[%s301_s27 + $0x8] sm:$0xff] %v2490_v60  ;;  %2491 = vst [vmem:[%s301_s27] sm:$0xff] %v2487_v42 }
 0x4b3   : > { %3659 = shalt.err (!%p3656_p10)
}
 0x4b4   : > { %s3660_s10 = scalar_lea.hbm %s4680_s16, 256  ;;  %s3664_s29 = scalar_lea.hbm %s4776_s4, 512 }
 0x4b5   : > { %p3661_p1 = scmp.ne.s32.totalorder %s4680_s16, %s3660_s10  ;;  %p3665_p7 = scmp.lt.s32.totalorder %s4680_s16, %s4776_s4 }
 0x4b6   : > { %p3666_p8 = scmp.lt.s32.totalorder %s3664_s29, %s3660_s10 }
 0x4b7   : > { %p3662_p4 = pnand %p3661_p1, %p4798_p9 }
 0x4b8   : > { %p3667_p11 = por %p3666_p8, %p3665_p7 }
 0x4b9   : > { %p3663_p3 = pneg %p3662_p4 }
 0x4bb   : > { %p3668_p6 = pnand %p3667_p11, %p3663_p3 }
 0x4bd   : > { %3671 = shalt.err (!%p3668_p6)
}
 0x4be   : > { %3392 = dma.vmem_to_hbm [thread:$0]  (%p4798_p9), %s4682_s0, 256, %s4680_s16, %s2830_s15  }
 0x4bf   : > { %s3013_s12 = sshll.u32 %s3962_s13, 5  ;;  %s3079_s0 = sshll.u32 %s3815_s22, 9 }
 0x4c0   : > { %s308_s27 = scalar_lea.vmem [#allocation9], %s3013_s12  ;;  %s4734_s16 = scalar_lea.hbm %s4777_s5, %s3079_s0 }
 0x4c1   : > { %s2863_s23 = sshll.u32 %s308_s27, 4  ;;  %s2835_s15 = scalar_lea.sflag [#allocation10], %s3962_s13  ;;  %s2864_s23 = int_to_ptr.vmem [resolvable:$true] %s2863_s23 }
 0x4c2   : > { %s3672_s22 = scalar_lea.vmem %s2864_s23, 512  ;;  %s3763_s28 = smov [#allocation9]  }
 0x4c3   : > { %p3673_p12 = scmp.ne.s32.totalorder %s2864_s23, %s3672_s22  ;;  %s3676_s2 = sshll.u32 %s3763_s28, 4  ;;  %s3677_s2 = int_to_ptr.vmem [resolvable:$false] %s3676_s2 }
 0x4c4   : > { %s3678_s26 = scalar_lea.vmem %s3677_s2, 1024  ;;  %p3679_p5 = scmp.lt.s32.totalorder %s2864_s23, %s3677_s2 }
 0x4c5   : > { %p3674_p13 = pnand %p3673_p12, %p4798_p9  ;;  %p3680_p2 = scmp.lt.s32.totalorder %s3678_s26, %s3672_s22 }
 0x4c7   : > { %p3675_p0 = pneg %p3674_p13  ;;  %p3681_p10 = por %p3680_p2, %p3679_p5 }
 0x4c9   : > { %p3682_p1 = pnand %p3681_p10, %p3675_p0 }
 0x4cd   : > { %v2771_v56 = vpop.permute.xlu0 %2770  ;;  %v2767_v15 = vpop.permute.xlu1 %2766 }
 0x4ce   : > { %v2813_v50 = vsel %vm385_vm0, %v2621_v61, %v2767_v15 }
 0x4cf   : > { %v2814_v58 = vsel %vm2484_vm5, %v2813_v50, %v2771_v56 }
 0x4d1   : > { %v2775_v53 = vpop.permute.xlu0 %2774  ;;  %v2779_v16 = vpop.permute.xlu1 %2778 }
 0x4d2   : > { %v2815_v62 = vsel %vm2486_vm6, %v2814_v58, %v2775_v53  ;;  %v2816_v34 = vsel %vm385_vm0, %v2625_v10, %v2779_v16 }
 0x4d3   : > { %2825 = vst [vmem:[%s308_s27] sm:$0xff] %v2815_v62 }
 0x4d5   : > { %v2783_v9 = vpop.permute.xlu1 %2782  ;;  %v2791_v2 = vpop.permute.xlu0 %2790 }
 0x4d6   : > { %v2817_v31 = vsel %vm2484_vm5, %v2816_v34, %v2783_v9  ;;  %v2819_v63 = vsel %vm385_vm0, %v2757_v48, %v2791_v2 }
 0x4d9   : > { %v2787_v20 = vpop.permute.xlu1 %2786  ;;  %v2795_v36 = vpop.permute.xlu0 %2794 }
 0x4da   : > { %v2818_v37 = vsel %vm2486_vm6, %v2817_v31, %v2787_v20  ;;  %v2820_v54 = vsel %vm2484_vm5, %v2819_v63, %v2795_v36 }
 0x4db   : > { %2826 = vst [vmem:[%s308_s27 + $0x8] sm:$0xff] %v2818_v37 }
 0x4dd   : > { %v2803_v1 = vpop.permute.xlu1 %2802  ;;  %v2799_v32 = vpop.permute.xlu0 %2798 }
 0x4de   : > { %v2821_v17 = vsel %vm2486_vm6, %v2820_v54, %v2799_v32  ;;  %v2822_v38 = vsel %vm385_vm0, %v2761_v44, %v2803_v1 }
 0x4df   : > { %2827 = vst [vmem:[%s308_s27 + $0x10] sm:$0xff] %v2821_v17 }
 0x4e1   : > { %v2807_v11 = vpop.permute.xlu1 %2806 }
 0x4e2   : > { %v2823_v8 = vsel %vm2484_vm5, %v2822_v38, %v2807_v11 }
 0x4e5   : > { %v2811_v46 = vpop.permute.xlu1 %2810 }
 0x4e6   : > { %v2824_v19 = vsel %vm2486_vm6, %v2823_v8, %v2811_v46 }
 0x4e7   : > { %2828 = vst [vmem:[%s308_s27 + $0x18] sm:$0xff] %v2824_v19 }
 0x4e8   : > { %3685 = shalt.err (!%p3682_p1)
}
 0x4e9   : > { %s3686_s9 = scalar_lea.hbm %s4734_s16, 512  ;;  %s3690_s24 = scalar_lea.hbm %s4777_s5, 1024 }
 0x4ea   : > { %p3687_p4 = scmp.ne.s32.totalorder %s4734_s16, %s3686_s9  ;;  %p3691_p8 = scmp.lt.s32.totalorder %s4734_s16, %s4777_s5 }
 0x4eb   : > { %p3692_p11 = scmp.lt.s32.totalorder %s3690_s24, %s3686_s9 }
 0x4ec   : > { %p3688_p3 = pnand %p3687_p4, %p4798_p9 }
 0x4ed   : > { %p3693_p6 = por %p3692_p11, %p3691_p8 }
 0x4ee   : > { %p3689_p7 = pneg %p3688_p3 }
 0x4f0   : > { %p3694_p12 = pnand %p3693_p6, %p3689_p7 }
 0x4f2   : > { %3697 = shalt.err (!%p3694_p12)
}
 0x4f3   : > { %3393 = dma.vmem_to_hbm [thread:$0]  (%p4798_p9), %s2864_s23, 512, %s4734_s16, %s2835_s15  }
 0x4f4 PF: > { %s2875_s17 = sand.u32 1, %s3736_s18   ;;  %p4799_p13 = scmp.ne.s32.totalorder %s4784_s25, 0 }
 0x4f5   : > { %p4800_p0 = scmp.ge.s32.totalorder %s3748_s21, 2  ;;  %s2876_s6 = scalar_lea.sflag [#allocation4], %s2875_s17 }
 0x4f7   : > { %p3408_p5 = pnand %p4800_p0, %p4799_p13 }
 0x4f9   : > { %p3409_p2 = pneg %p3408_p5 }
 0x4fb   : > { %3727 = dma.done.wait (%p3409_p2), %s2876_s6, 256  }
 0x4fc   : > { %3729 = vsyncadd (%p3409_p2), %s2876_s6, 4294967040  ;;  %s2885_s12 = scalar_lea.sflag [#allocation10], %s2875_s17 }
 0x4fd   : > { %3731 = dma.done.wait (%p3409_p2), %s2885_s12, 512  }
 0x4fe   : > { %3733 = vsyncadd (%p3409_p2), %s2885_s12, 4294966784  ;;  %s4801_s14 = sld [smem:[#allocation16_spill]]  ;;  %p25_p9 = scmp.ge.s32.totalorder %s3848_s30, 4  }
 0x4ff   : > { %s4802_s18 = smov %s3740_s19  ;;  %s4803_s19 = smov %s3744_s20 }
 0x500   : > { %s4805_s21 = smov %s3848_s30  ;;  %27 = sbr.rel (!%p25_p9) target bundleno = 12 (0xc), region = 115 }
 0x504   : > { %s4804_s20 = smov %s4801_s14 }
 0x505   :  { %2890 = vsyncpa [#allocation3], 1 }
 0x506   :  { %2892 = vsyncpa [#allocation3 + $0x1], 1 }
 0x507   :  { %2893 = vsyncpa [#allocation6], 1 }
 0x508   :  { %2895 = vsyncpa [#allocation6 + $0x1], 1 }
 0x509   :  { %2896 = vsyncpa [#allocation4], 1 }
 0x50a   :  { %2898 = vsyncpa [#allocation4 + $0x1], 1 }
 0x50b   :  { %2899 = vsyncpa [#allocation10], 1 }
 0x50c   :  { %2901 = vsyncpa [#allocation10 + $0x1], 1 }

</bundles_post_ra>
